<compile_context>
chip_gen: v7x
topology: tpu7x:2x2x1
jax: 0.10.0
libtpu: 0.0.40
codegen_flags: <defaults>
</compile_context>

<pallas_src>
import functools

import jax
import jax.numpy as jnp
from jax import lax
from jax.experimental import pallas as pl
from jax.experimental.pallas import tpu as pltpu

EPS = 1e-5  # PyTorch BatchNorm2d default eps


# ---------------------------------------------------------------------------
# Pallas kernel: fused conv (stride 1) + folded-BN affine
# ---------------------------------------------------------------------------
def _conv_bn_kernel(x_ref, w_ref, s_ref, b_ref, o_ref, *, taps, kw, wp_ext, m_ext):
    """One batch image per grid step.

    x_ref : (Lin, Cin)  f32   flattened, zero-padded image (Lin = Hp*Wp_ext + kw-1)
    w_ref : (taps, Cin, Cout) bf16   per-tap weight matrices
    s_ref : (1, Cout)   f32   folded BN scale
    b_ref : (1, Cout)   f32   folded BN bias (includes conv bias)
    o_ref : (m_ext, Cout)     extended output rows (m_ext = H_out * Wp_ext)
    """
    cout = o_ref.shape[-1]
    acc = jnp.zeros((m_ext, cout), jnp.float32)
    # Static unrolled loop over kernel taps: each tap is a shifted flat window of
    # the padded image -> one accumulating bf16 MXU matmul with f32 accumulation.
    for t in range(taps):
        off = (t // kw) * wp_ext + (t % kw)
        a = x_ref[off:off + m_ext, :].astype(jnp.bfloat16)
        acc = acc + jnp.dot(a, w_ref[t], preferred_element_type=jnp.float32)
    # Fused BatchNorm affine epilogue (f32), then store.
    o_ref[...] = (acc * s_ref[...] + b_ref[...]).astype(o_ref.dtype)


def basic_conv2d_forward(x_nchw, w_taps, scale, bias, *, kh, kw, ph, pw):
    """Fused Conv2d(kh,kw, stride=1, padding=(ph,pw)) + eval-mode BatchNorm2d.

    x_nchw : (N, Cin, H, W) f32, PyTorch layout.
    w_taps : (kh*kw, Cin, Cout) bf16  (from fold_conv_bn)
    scale, bias : (1, Cout) f32       (from fold_conv_bn)
    Returns (N, Cout, H_out, W_out) f32.
    """
    n, cin, h, w = x_nchw.shape
    cout = w_taps.shape[-1]
    h_out = h + 2 * ph - kh + 1
    w_out = w + 2 * pw - kw + 1
    # Extra (kw-1) right-halo columns so every W-tap of every extended output row
    # stays in-bounds when the image is flattened; the halo columns of the output
    # are garbage and sliced off below (small, known overcompute for kw > 1).
    wp_ext = w + 2 * pw + (kw - 1)
    hp = h + 2 * ph
    m_ext = h_out * wp_ext
    lin = hp * wp_ext + (kw - 1)

    # Host-side layout plumbing (pad + flatten); all compute stays in the kernel.
    x = jnp.transpose(x_nchw, (0, 2, 3, 1))                       # NHWC
    x = jnp.pad(x, ((0, 0), (ph, ph), (pw, pw + kw - 1), (0, 0)))  # (N, Hp, Wp_ext, Cin)
    x = x.reshape(n, hp * wp_ext, cin)
    if kw > 1:
        x = jnp.pad(x, ((0, 0), (0, kw - 1), (0, 0)))              # flat tail halo

    kernel = functools.partial(_conv_bn_kernel, taps=kh * kw, kw=kw,
                               wp_ext=wp_ext, m_ext=m_ext)

    out_ext = pl.pallas_call(
        kernel,
        out_shape=jax.ShapeDtypeStruct((n, m_ext, cout), x_nchw.dtype),
        grid_spec=pltpu.PrefetchScalarGridSpec(
            num_scalar_prefetch=0,
            grid=(n,),  # one image per step; no K grid, no scratch accumulator
            in_specs=[
                pl.BlockSpec((None, lin, cin), lambda b: (b, 0, 0)),
                pl.BlockSpec((kh * kw, cin, cout), lambda b: (0, 0, 0)),
                pl.BlockSpec((1, cout), lambda b: (0, 0)),
                pl.BlockSpec((1, cout), lambda b: (0, 0)),
            ],
            out_specs=pl.BlockSpec((None, m_ext, cout), lambda b: (b, 0, 0)),
        ),
        compiler_params=pltpu.CompilerParams(
            dimension_semantics=("parallel",)),
    )(x, w_taps, scale, bias)

    out = out_ext.reshape(n, h_out, wp_ext, cout)[:, :, :w_out, :]
    return jnp.transpose(out, (0, 3, 1, 2))                       # back to NCHW


# ---------------------------------------------------------------------------
# One-time parameter preprocessing (outside the jitted hot path)
# ---------------------------------------------------------------------------
def fold_conv_bn(w, b, gamma, beta, mean, var):
    """Fold conv bias + eval-mode BatchNorm into per-channel scale/bias and
    reshape the conv weight into per-tap (Cin, Cout) matmul matrices (bf16)."""
    cout, cin, kh, kw = w.shape
    scale = gamma / jnp.sqrt(var + EPS)
    bias = beta + scale * (b - mean)
    w_taps = jnp.transpose(w, (2, 3, 1, 0)).reshape(kh * kw, cin, cout)
    return (w_taps.astype(jnp.bfloat16),
            scale.reshape(1, cout).astype(jnp.float32),
            bias.reshape(1, cout).astype(jnp.float32))


def make_conv_bn_params(key, cin, cout, kh, kw):
    k_w, k_b, k_g, k_be, k_m, k_v = jax.random.split(key, 6)
    fan_in = cin * kh * kw
    return dict(
        w=jax.random.normal(k_w, (cout, cin, kh, kw), jnp.float32) / jnp.sqrt(fan_in),
        b=0.05 * jax.random.normal(k_b, (cout,), jnp.float32),
        gamma=1.0 + 0.1 * jax.random.normal(k_g, (cout,), jnp.float32),
        beta=0.05 * jax.random.normal(k_be, (cout,), jnp.float32),
        mean=0.05 * jax.random.normal(k_m, (cout,), jnp.float32),
        var=1.0 + 0.1 * jax.random.uniform(k_v, (cout,), jnp.float32),
    )


# ---------------------------------------------------------------------------
# Pure-JAX reference (same bf16 operand quantization, f32 accumulation)
# ---------------------------------------------------------------------------
def reference_forward(x, p, ph, pw):
    z = lax.conv_general_dilated(
        x.astype(jnp.bfloat16), p["w"].astype(jnp.bfloat16),
        window_strides=(1, 1), padding=[(ph, ph), (pw, pw)],
        dimension_numbers=("NCHW", "OIHW", "NCHW"),
        preferred_element_type=jnp.float32)
    z = z + p["b"].reshape(1, -1, 1, 1)
    return (p["gamma"].reshape(1, -1, 1, 1)
            * (z - p["mean"].reshape(1, -1, 1, 1))
            / jnp.sqrt(p["var"].reshape(1, -1, 1, 1) + EPS)
            + p["beta"].reshape(1, -1, 1, 1))


# ---------------------------------------------------------------------------
if __name__ == "__main__":
    key = jax.random.PRNGKey(0)
    k_x, k_p1, k_p2 = jax.random.split(key, 3)

    # Small deterministic test problem: BasicConv2d(16 -> 32, kernel 3x3, padding 1)
    N, C_IN, H, W = 2, 16, 16, 16
    C_OUT = 32
    x = jax.random.normal(k_x, (N, C_IN, H, W), jnp.float32)

    # --- 3x3 conv, padding 1 ---
    KH, KW, PH, PW = 3, 3, 1, 1
    raw = make_conv_bn_params(k_p1, C_IN, C_OUT, KH, KW)
    w_taps, scale, bias = fold_conv_bn(raw["w"], raw["b"], raw["gamma"],
                                       raw["beta"], raw["mean"], raw["var"])
    fwd = jax.jit(functools.partial(basic_conv2d_forward, kh=KH, kw=KW, ph=PH, pw=PW))
    out = jax.block_until_ready(fwd(x, w_taps, scale, bias))
    ref = reference_forward(x, raw, PH, PW)
    assert out.shape == ref.shape == (N, C_OUT, H, W), (out.shape, ref.shape)
    err = float(jnp.max(jnp.abs(out - ref)))
    assert err < 2e-2, f"3x3 mismatch vs reference: max abs err {err}"

    # --- 1x1 conv (other common BasicConv2d config) ---
    raw2 = make_conv_bn_params(k_p2, C_IN, C_OUT, 1, 1)
    w_taps2, scale2, bias2 = fold_conv_bn(raw2["w"], raw2["b"], raw2["gamma"],
                                          raw2["beta"], raw2["mean"], raw2["var"])
    fwd2 = jax.jit(functools.partial(basic_conv2d_forward, kh=1, kw=1, ph=0, pw=0))
    out2 = jax.block_until_ready(fwd2(x, w_taps2, scale2, bias2))
    ref2 = reference_forward(x, raw2, 0, 0)
    err2 = float(jnp.max(jnp.abs(out2 - ref2)))
    assert err2 < 2e-2, f"1x1 mismatch vs reference: max abs err {err2}"

    print("KERNEL_OK")
</pallas_src>

<mosaic_0001>
module attributes {stable_mosaic.version = 11 : i64} {
  func.func @_conv_bn_kernel(%arg0: i32, %arg1: memref<1x362x16xf32, #tpu.memory_space<vmem>>, %arg2: memref<9x16x32xbf16, #tpu.memory_space<vmem>>, %arg3: memref<1x32xf32, #tpu.memory_space<vmem>>, %arg4: memref<1x32xf32, #tpu.memory_space<vmem>>, %arg5: memref<1x320x32xf32, #tpu.memory_space<vmem>>) attributes {dimension_semantics = [#tpu.dimension_semantics<parallel>], iteration_bounds = array<i64: 2>, scalar_prefetch = 0 : i64, scratch_operands = 0 : i64, tpu.core_type = #tpu.core_type<tc>, window_params = [{transform_indices = @transform_0, window_bounds = array<i64: 1, 362, 16>}, {pipeline_mode = #tpu.pipeline_mode<synchronous>, transform_indices = @transform_1, window_bounds = array<i64: 9, 16, 32>}, {pipeline_mode = #tpu.pipeline_mode<synchronous>, transform_indices = @transform_2, window_bounds = array<i64: 1, 32>}, {pipeline_mode = #tpu.pipeline_mode<synchronous>, transform_indices = @transform_3, window_bounds = array<i64: 1, 32>}, {transform_indices = @transform_4, window_bounds = array<i64: 1, 320, 32>}]} {
    %cst = arith.constant 0.000000e+00 : f32
    %0 = vector.broadcast %cst : f32 to vector<320x32xf32>
    %c0 = arith.constant 0 : index
    %c0_0 = arith.constant 0 : index
    %c0_1 = arith.constant 0 : index
    %1 = vector.load %arg1[%c0, %c0_0, %c0_1] : memref<1x362x16xf32, #tpu.memory_space<vmem>>, vector<1x320x16xf32>
    %2 = vector.shape_cast %1 : vector<1x320x16xf32> to vector<320x16xf32>
    %3 = arith.truncf %2 : vector<320x16xf32> to vector<320x16xbf16>
    %c0_2 = arith.constant 0 : index
    %c0_3 = arith.constant 0 : index
    %c0_4 = arith.constant 0 : index
    %4 = vector.load %arg2[%c0_2, %c0_3, %c0_4] : memref<9x16x32xbf16, #tpu.memory_space<vmem>>, vector<1x16x32xbf16>
    %5 = vector.shape_cast %4 : vector<1x16x32xbf16> to vector<16x32xbf16>
    %cst_5 = arith.constant dense<0.000000e+00> : vector<320x32xf32>
    %6 = tpu.matmul %3, %5, %cst_5 {dimension_numbers = #tpu.dot_dimension_numbers<[1], [0], [0], [1], [0, 0, 1, 1], [], []>} : vector<320x16xbf16>, vector<16x32xbf16>, vector<320x32xf32> -> vector<320x32xf32>
    %7 = arith.addf %0, %6 : vector<320x32xf32>
    %c0_6 = arith.constant 0 : index
    %c1 = arith.constant 1 : index
    %c0_7 = arith.constant 0 : index
    %8 = vector.load %arg1[%c0_6, %c1, %c0_7] : memref<1x362x16xf32, #tpu.memory_space<vmem>>, vector<1x320x16xf32>
    %9 = vector.shape_cast %8 : vector<1x320x16xf32> to vector<320x16xf32>
    %10 = arith.truncf %9 : vector<320x16xf32> to vector<320x16xbf16>
    %c1_8 = arith.constant 1 : index
    %c0_9 = arith.constant 0 : index
    %c0_10 = arith.constant 0 : index
    %11 = vector.load %arg2[%c1_8, %c0_9, %c0_10] : memref<9x16x32xbf16, #tpu.memory_space<vmem>>, vector<1x16x32xbf16>
    %12 = vector.shape_cast %11 : vector<1x16x32xbf16> to vector<16x32xbf16>
    %cst_11 = arith.constant dense<0.000000e+00> : vector<320x32xf32>
    %13 = tpu.matmul %10, %12, %cst_11 {dimension_numbers = #tpu.dot_dimension_numbers<[1], [0], [0], [1], [0, 0, 1, 1], [], []>} : vector<320x16xbf16>, vector<16x32xbf16>, vector<320x32xf32> -> vector<320x32xf32>
    %14 = arith.addf %7, %13 : vector<320x32xf32>
    %c0_12 = arith.constant 0 : index
    %c2 = arith.constant 2 : index
    %c0_13 = arith.constant 0 : index
    %15 = vector.load %arg1[%c0_12, %c2, %c0_13] : memref<1x362x16xf32, #tpu.memory_space<vmem>>, vector<1x320x16xf32>
    %16 = vector.shape_cast %15 : vector<1x320x16xf32> to vector<320x16xf32>
    %17 = arith.truncf %16 : vector<320x16xf32> to vector<320x16xbf16>
    %c2_14 = arith.constant 2 : index
    %c0_15 = arith.constant 0 : index
    %c0_16 = arith.constant 0 : index
    %18 = vector.load %arg2[%c2_14, %c0_15, %c0_16] : memref<9x16x32xbf16, #tpu.memory_space<vmem>>, vector<1x16x32xbf16>
    %19 = vector.shape_cast %18 : vector<1x16x32xbf16> to vector<16x32xbf16>
    %cst_17 = arith.constant dense<0.000000e+00> : vector<320x32xf32>
    %20 = tpu.matmul %17, %19, %cst_17 {dimension_numbers = #tpu.dot_dimension_numbers<[1], [0], [0], [1], [0, 0, 1, 1], [], []>} : vector<320x16xbf16>, vector<16x32xbf16>, vector<320x32xf32> -> vector<320x32xf32>
    %21 = arith.addf %14, %20 : vector<320x32xf32>
    %c0_18 = arith.constant 0 : index
    %c20 = arith.constant 20 : index
    %c0_19 = arith.constant 0 : index
    %22 = vector.load %arg1[%c0_18, %c20, %c0_19] : memref<1x362x16xf32, #tpu.memory_space<vmem>>, vector<1x320x16xf32>
    %23 = vector.shape_cast %22 : vector<1x320x16xf32> to vector<320x16xf32>
    %24 = arith.truncf %23 : vector<320x16xf32> to vector<320x16xbf16>
    %c3 = arith.constant 3 : index
    %c0_20 = arith.constant 0 : index
    %c0_21 = arith.constant 0 : index
    %25 = vector.load %arg2[%c3, %c0_20, %c0_21] : memref<9x16x32xbf16, #tpu.memory_space<vmem>>, vector<1x16x32xbf16>
    %26 = vector.shape_cast %25 : vector<1x16x32xbf16> to vector<16x32xbf16>
    %cst_22 = arith.constant dense<0.000000e+00> : vector<320x32xf32>
    %27 = tpu.matmul %24, %26, %cst_22 {dimension_numbers = #tpu.dot_dimension_numbers<[1], [0], [0], [1], [0, 0, 1, 1], [], []>} : vector<320x16xbf16>, vector<16x32xbf16>, vector<320x32xf32> -> vector<320x32xf32>
    %28 = arith.addf %21, %27 : vector<320x32xf32>
    %c0_23 = arith.constant 0 : index
    %c21 = arith.constant 21 : index
    %c0_24 = arith.constant 0 : index
    %29 = vector.load %arg1[%c0_23, %c21, %c0_24] : memref<1x362x16xf32, #tpu.memory_space<vmem>>, vector<1x320x16xf32>
    %30 = vector.shape_cast %29 : vector<1x320x16xf32> to vector<320x16xf32>
    %31 = arith.truncf %30 : vector<320x16xf32> to vector<320x16xbf16>
    %c4 = arith.constant 4 : index
    %c0_25 = arith.constant 0 : index
    %c0_26 = arith.constant 0 : index
    %32 = vector.load %arg2[%c4, %c0_25, %c0_26] : memref<9x16x32xbf16, #tpu.memory_space<vmem>>, vector<1x16x32xbf16>
    %33 = vector.shape_cast %32 : vector<1x16x32xbf16> to vector<16x32xbf16>
    %cst_27 = arith.constant dense<0.000000e+00> : vector<320x32xf32>
    %34 = tpu.matmul %31, %33, %cst_27 {dimension_numbers = #tpu.dot_dimension_numbers<[1], [0], [0], [1], [0, 0, 1, 1], [], []>} : vector<320x16xbf16>, vector<16x32xbf16>, vector<320x32xf32> -> vector<320x32xf32>
    %35 = arith.addf %28, %34 : vector<320x32xf32>
    %c0_28 = arith.constant 0 : index
    %c22 = arith.constant 22 : index
    %c0_29 = arith.constant 0 : index
    %36 = vector.load %arg1[%c0_28, %c22, %c0_29] : memref<1x362x16xf32, #tpu.memory_space<vmem>>, vector<1x320x16xf32>
    %37 = vector.shape_cast %36 : vector<1x320x16xf32> to vector<320x16xf32>
    %38 = arith.truncf %37 : vector<320x16xf32> to vector<320x16xbf16>
    %c5 = arith.constant 5 : index
    %c0_30 = arith.constant 0 : index
    %c0_31 = arith.constant 0 : index
    %39 = vector.load %arg2[%c5, %c0_30, %c0_31] : memref<9x16x32xbf16, #tpu.memory_space<vmem>>, vector<1x16x32xbf16>
    %40 = vector.shape_cast %39 : vector<1x16x32xbf16> to vector<16x32xbf16>
    %cst_32 = arith.constant dense<0.000000e+00> : vector<320x32xf32>
    %41 = tpu.matmul %38, %40, %cst_32 {dimension_numbers = #tpu.dot_dimension_numbers<[1], [0], [0], [1], [0, 0, 1, 1], [], []>} : vector<320x16xbf16>, vector<16x32xbf16>, vector<320x32xf32> -> vector<320x32xf32>
    %42 = arith.addf %35, %41 : vector<320x32xf32>
    %c0_33 = arith.constant 0 : index
    %c40 = arith.constant 40 : index
    %c0_34 = arith.constant 0 : index
    %43 = vector.load %arg1[%c0_33, %c40, %c0_34] : memref<1x362x16xf32, #tpu.memory_space<vmem>>, vector<1x320x16xf32>
    %44 = vector.shape_cast %43 : vector<1x320x16xf32> to vector<320x16xf32>
    %45 = arith.truncf %44 : vector<320x16xf32> to vector<320x16xbf16>
    %c6 = arith.constant 6 : index
    %c0_35 = arith.constant 0 : index
    %c0_36 = arith.constant 0 : index
    %46 = vector.load %arg2[%c6, %c0_35, %c0_36] : memref<9x16x32xbf16, #tpu.memory_space<vmem>>, vector<1x16x32xbf16>
    %47 = vector.shape_cast %46 : vector<1x16x32xbf16> to vector<16x32xbf16>
    %cst_37 = arith.constant dense<0.000000e+00> : vector<320x32xf32>
    %48 = tpu.matmul %45, %47, %cst_37 {dimension_numbers = #tpu.dot_dimension_numbers<[1], [0], [0], [1], [0, 0, 1, 1], [], []>} : vector<320x16xbf16>, vector<16x32xbf16>, vector<320x32xf32> -> vector<320x32xf32>
    %49 = arith.addf %42, %48 : vector<320x32xf32>
    %c0_38 = arith.constant 0 : index
    %c41 = arith.constant 41 : index
    %c0_39 = arith.constant 0 : index
    %50 = vector.load %arg1[%c0_38, %c41, %c0_39] : memref<1x362x16xf32, #tpu.memory_space<vmem>>, vector<1x320x16xf32>
    %51 = vector.shape_cast %50 : vector<1x320x16xf32> to vector<320x16xf32>
    %52 = arith.truncf %51 : vector<320x16xf32> to vector<320x16xbf16>
    %c7 = arith.constant 7 : index
    %c0_40 = arith.constant 0 : index
    %c0_41 = arith.constant 0 : index
    %53 = vector.load %arg2[%c7, %c0_40, %c0_41] : memref<9x16x32xbf16, #tpu.memory_space<vmem>>, vector<1x16x32xbf16>
    %54 = vector.shape_cast %53 : vector<1x16x32xbf16> to vector<16x32xbf16>
    %cst_42 = arith.constant dense<0.000000e+00> : vector<320x32xf32>
    %55 = tpu.matmul %52, %54, %cst_42 {dimension_numbers = #tpu.dot_dimension_numbers<[1], [0], [0], [1], [0, 0, 1, 1], [], []>} : vector<320x16xbf16>, vector<16x32xbf16>, vector<320x32xf32> -> vector<320x32xf32>
    %56 = arith.addf %49, %55 : vector<320x32xf32>
    %c0_43 = arith.constant 0 : index
    %c42 = arith.constant 42 : index
    %c0_44 = arith.constant 0 : index
    %57 = vector.load %arg1[%c0_43, %c42, %c0_44] : memref<1x362x16xf32, #tpu.memory_space<vmem>>, vector<1x320x16xf32>
    %58 = vector.shape_cast %57 : vector<1x320x16xf32> to vector<320x16xf32>
    %59 = arith.truncf %58 : vector<320x16xf32> to vector<320x16xbf16>
    %c8 = arith.constant 8 : index
    %c0_45 = arith.constant 0 : index
    %c0_46 = arith.constant 0 : index
    %60 = vector.load %arg2[%c8, %c0_45, %c0_46] : memref<9x16x32xbf16, #tpu.memory_space<vmem>>, vector<1x16x32xbf16>
    %61 = vector.shape_cast %60 : vector<1x16x32xbf16> to vector<16x32xbf16>
    %cst_47 = arith.constant dense<0.000000e+00> : vector<320x32xf32>
    %62 = tpu.matmul %59, %61, %cst_47 {dimension_numbers = #tpu.dot_dimension_numbers<[1], [0], [0], [1], [0, 0, 1, 1], [], []>} : vector<320x16xbf16>, vector<16x32xbf16>, vector<320x32xf32> -> vector<320x32xf32>
    %63 = arith.addf %56, %62 : vector<320x32xf32>
    %c0_48 = arith.constant 0 : index
    %c0_49 = arith.constant 0 : index
    %64 = vector.load %arg3[%c0_48, %c0_49] : memref<1x32xf32, #tpu.memory_space<vmem>>, vector<1x32xf32>
    %65 = vector.broadcast %64 : vector<1x32xf32> to vector<320x32xf32>
    %66 = arith.mulf %63, %65 : vector<320x32xf32>
    %c0_50 = arith.constant 0 : index
    %c0_51 = arith.constant 0 : index
    %67 = vector.load %arg4[%c0_50, %c0_51] : memref<1x32xf32, #tpu.memory_space<vmem>>, vector<1x32xf32>
    %68 = vector.broadcast %67 : vector<1x32xf32> to vector<320x32xf32>
    %69 = arith.addf %66, %68 : vector<320x32xf32>
    %c0_52 = arith.constant 0 : index
    %c0_53 = arith.constant 0 : index
    %c0_54 = arith.constant 0 : index
    %70 = vector.load %arg5[%c0_52, %c0_53, %c0_54] : memref<1x320x32xf32, #tpu.memory_space<vmem>>, vector<1x320x32xf32>
    %71 = vector.shape_cast %70 : vector<1x320x32xf32> to vector<320x32xf32>
    %72 = vector.shape_cast %69 : vector<320x32xf32> to vector<1x320x32xf32>
    tpu.vector_store %arg5[%c0_52, %c0_53, %c0_54], %72 {strides = array<i32>} : memref<1x320x32xf32, #tpu.memory_space<vmem>>, vector<1x320x32xf32>,
    return
  }
  func.func @transform_0(%arg0: i32) -> (i32, i32, i32) {
    %c0_i32 = arith.constant 0 : i32
    %c0_i32_0 = arith.constant 0 : i32
    %c0_i32_1 = arith.constant 0 : i32
    return %arg0, %c0_i32, %c0_i32_0 : i32, i32, i32
  }
  func.func @transform_1(%arg0: i32) -> (i32, i32, i32) {
    %c0_i32 = arith.constant 0 : i32
    %c0_i32_0 = arith.constant 0 : i32
    %c0_i32_1 = arith.constant 0 : i32
    %c0_i32_2 = arith.constant 0 : i32
    return %c0_i32, %c0_i32_0, %c0_i32_1 : i32, i32, i32
  }
  func.func @transform_2(%arg0: i32) -> (i32, i32) {
    %c0_i32 = arith.constant 0 : i32
    %c0_i32_0 = arith.constant 0 : i32
    %c0_i32_1 = arith.constant 0 : i32
    return %c0_i32, %c0_i32_0 : i32, i32
  }
  func.func @transform_3(%arg0: i32) -> (i32, i32) {
    %c0_i32 = arith.constant 0 : i32
    %c0_i32_0 = arith.constant 0 : i32
    %c0_i32_1 = arith.constant 0 : i32
    return %c0_i32, %c0_i32_0 : i32, i32
  }
  func.func @transform_4(%arg0: i32) -> (i32, i32, i32) {
    %c0_i32 = arith.constant 0 : i32
    %c0_i32_0 = arith.constant 0 : i32
    %c0_i32_1 = arith.constant 0 : i32
    return %arg0, %c0_i32, %c0_i32_0 : i32, i32, i32
  }
}

</mosaic_0001>

<bundles_post_ra>
// kernel: basic_conv2d_forward.1
= control target key start
LH: loop header
LB: loop body
LE: loop exit
PB: predicated region body
PF: predicated region fallthrough
CT: control target
= control target key end

     0   :  { %s4724_s15 = smov 0   ;;  %s5770_s0 = inlined_call_operand.vmem [shape: f32[2,362,16], index: 0, kind: input, shape index: {}]   ;;  %s5771_s1 = inlined_call_operand.vmem [shape: bf16[9,16,32], index: 1, kind: input, shape index: {}]   ;;  %s5772_s2 = inlined_call_operand.vmem [shape: f32[1,32], index: 2, kind: input, shape index: {}]   ;;  %s5773_s3 = inlined_call_operand.vmem [shape: f32[1,32], index: 3, kind: input, shape index: {}]   ;;  %s5774_s4 = inlined_call_operand.vmem [shape: f32[2,320,32], index: 4, kind: output, shape index: {}]  }
   0x1 LB: > { %s3567_s16 = sadd.s32 4294967295, %s4697_s15   ;;  %p3571_p0 = scmp.ge.s32.totalorder %s4697_s15, 1  ;;  %s4697_s15 = sphi %s4724_s15, %s14_s15  }
   0x2   : > { %p162_p1 = scmp.lt.s32.totalorder %s4697_s15, 3 }
   0x4   : > { %p163_p2 = pnand %p3571_p0, %p162_p1 }
   0x6   : > { %166 = sbr.rel (%p163_p2) target bundleno = 598 (0x256), region = 36 }
   0xd   : > { %v4682_v0 = vld [vmem:[%s5771_s1 + $0x8] sm:$0xff]   ;;  %p188_p3 = scmp.lt.s32.totalorder %s3567_s16, 1  ;;  %v4738_v1 = vld [vmem:[%s5771_s1 + $0x20] sm:$0xff]   ;;  %vm330_vm0 = vcmask 130048   ;;  %v4765_v11 = vld [vmem:[%s5771_s1 + $0x30] sm:$0xff]   ;;  %vm3471_vm1 = vcmask 261120  }
   0xe   : > { %3972 = vmatprep.subr.bf16.mxu1 %v4682_v0  ;;  %v4684_v2 = vld [vmem:[%s5771_s1] sm:$0xff]   ;;  %4140 = vmatprep.subr.bf16.mxu0 %v4738_v1  ;;  %v4685_v3 = vld [vmem:[%s5771_s1 + $0x28] sm:$0xff]   ;;  %v4782_v23 = vld [vmem:[%s5771_s1 + $0x10] sm:$0xff]  }
   0xf   : > { %s5779_s16 = smov (!%p188_p3, %s3567_s16), 1  ;;  %3973 = vmatpush3.bf16.msra.mxu1 %v4682_v0  ;;  %4141 = vmatpush3.bf16.msra.mxu0 %v4738_v1 }
  0x10   : > { %s4672_s25 = smul.u32 368, %s5779_s16  ;;  %4014 = vmatprep.subr.bf16.mxu1 %v4684_v2  ;;  %4182 = vmatprep.subr.bf16.mxu0 %v4685_v3 }
  0x11   : > { %s4673_s13 = smul.u32 320, %s5779_s16 }
  0x12   : > { %s4754_s28 = scalar_lea.vmem %s5770_s0, %s4672_s25 }
  0x13   : > { %v261_v4 = vld [vmem:[%s4754_s28 + $0x1] sm:$0xff]  ;;  %v262_v5 = vld [vmem:[%s4754_s28 + $0x9] sm:$0xff]  ;;  %v1567_v6 = vld [vmem:[%s4754_s28 + $0x15] sm:$0xff]  ;;  %s5597_s21 = scalar_lea.vmem %s5774_s4, %s4673_s13 }
  0x14   : > { %v301_v7 = vpack.c.bf16 %v262_v5, %v261_v4  ;;  %v1568_v8 = vld [vmem:[%s4754_s28 + $0x1d] sm:$0xff]  ;;  %v263_v9 = vld [vmem:[%s4754_s28 + $0x11] sm:$0xff]  ;;  %v1569_v14 = vld [vmem:[%s4754_s28 + $0x25] sm:$0xff] }
  0x15   : > { %v264_v10 = vld [vmem:[%s4754_s28 + $0x19] sm:$0xff]  ;;  %v1607_v12 = vpack.c.bf16 %v1568_v8, %v1567_v6  ;;  %v1570_v15 = vld [vmem:[%s4754_s28 + $0x2d] sm:$0xff]  ;;  %v265_v16 = vld [vmem:[%s4754_s28 + $0x21] sm:$0xff] }
  0x16   : > { %v302_v13 = vpack.c.bf16 %v264_v10, %v263_v9  ;;  %3974 = vmatprep.mubr.msk.bf16.mxu1 %vm330_vm0, %v301_v7  ;;  %v1608_v17 = vpack.c.bf16 %v1570_v15, %v1569_v14  ;;  %v4772_v18 = vld [vmem:[%s4754_s28 + $0x29] sm:$0xff]  ;;  %v1571_v19 = vld [vmem:[%s4754_s28 + $0x35] sm:$0xff]  ;;  %v1572_v20 = vld [vmem:[%s4754_s28 + $0x3d] sm:$0xff] }
  0x17   : > { %4142 = vmatprep.mubr.msk.bf16.mxu0 %vm330_vm0, %v1607_v12  ;;  %v303_v21 = vpack.c.bf16 %v4772_v18, %v265_v16  ;;  %v1609_v22 = vpack.c.bf16 %v1572_v20, %v1571_v19  ;;  %v4786_v24 = vld [vmem:[%s4754_s28 + $0x31] sm:$0xff]  ;;  %v4789_v25 = vld [vmem:[%s4754_s28 + $0x39] sm:$0xff]  ;;  %v1573_v26 = vld [vmem:[%s4754_s28 + $0x45] sm:$0xff] }
  0x18   : > { %3975 = vmatmul.mubr.msk.bf16.vlgmr.msra.gmra.mrb[0].mxu1 %vm330_vm0, %v302_v13  ;;  %4143 = vmatmul.mubr.msk.bf16.vlgmr.msra.gmra.mrb[0].mxu0 %vm330_vm0, %v1608_v17  ;;  %v1574_v27 = vld [vmem:[%s4754_s28 + $0x4d] sm:$0xff]  ;;  %v4795_v28 = vld [vmem:[%s4754_s28 + $0x41] sm:$0xff]  ;;  %v1575_v30 = vld [vmem:[%s4754_s28 + $0x55] sm:$0xff]  ;;  %v304_v32 = vpack.c.bf16 %v4789_v25, %v4786_v24 }
  0x19   : > { %4015 = vmatpush3.bf16.msra.mxu1 %v4684_v2  ;;  %4183 = vmatpush3.bf16.msra.mxu0 %v4685_v3  ;;  %v4798_v29 = vld [vmem:[%s4754_s28 + $0x49] sm:$0xff]  ;;  %v1576_v31 = vld [vmem:[%s4754_s28 + $0x5d] sm:$0xff]  ;;  %v1610_v33 = vpack.c.bf16 %v1574_v27, %v1573_v26  ;;  %v4813_v36 = vld [vmem:[%s4754_s28 + $0x51] sm:$0xff] }
  0x1a   : > { %3978 = vmatprep.mubr.msk.bf16.mxu1 %vm330_vm0, %v303_v21  ;;  %4146 = vmatprep.mubr.msk.bf16.mxu0 %vm330_vm0, %v1609_v22  ;;  %v305_v34 = vpack.c.bf16 %v4798_v29, %v4795_v28  ;;  %v1611_v35 = vpack.c.bf16 %v1576_v31, %v1575_v30  ;;  %v4816_v37 = vld [vmem:[%s4754_s28 + $0x59] sm:$0xff]  ;;  %v1577_v38 = vld [vmem:[%s4754_s28 + $0x65] sm:$0xff]  ;;  %v1578_v39 = vld [vmem:[%s4754_s28 + $0x6d] sm:$0xff] }
  0x1b   : > { %4224 = vmatprep.subr.bf16.mxu0 %v4765_v11  ;;  %4056 = vmatprep.subr.bf16.mxu1 %v4782_v23  ;;  %v4822_v40 = vld [vmem:[%s4754_s28 + $0x61] sm:$0xff]  ;;  %v4825_v41 = vld [vmem:[%s4754_s28 + $0x69] sm:$0xff]  ;;  %v1579_v42 = vld [vmem:[%s4754_s28 + $0x75] sm:$0xff]  ;;  %v306_v44 = vpack.c.bf16 %v4816_v37, %v4813_v36  ;;  %v1612_v45 = vpack.c.bf16 %v1578_v39, %v1577_v38 }
  0x1c   : > { %v1580_v43 = vld [vmem:[%s4754_s28 + $0x7d] sm:$0xff]  ;;  %v307_v46 = vpack.c.bf16 %v4825_v41, %v4822_v40  ;;  %v4837_v48 = vld [vmem:[%s4754_s28 + $0x71] sm:$0xff]  ;;  %v1581_v50 = vld [vmem:[%s4754_s28 + $0x85] sm:$0xff] }
  0x1d   : > { %v1613_v47 = vpack.c.bf16 %v1580_v43, %v1579_v42  ;;  %v4840_v49 = vld [vmem:[%s4754_s28 + $0x79] sm:$0xff]  ;;  %v1582_v51 = vld [vmem:[%s4754_s28 + $0x8d] sm:$0xff]  ;;  %v4846_v52 = vld [vmem:[%s4754_s28 + $0x81] sm:$0xff] }
  0x1e   : > { %v4849_v53 = vld [vmem:[%s4754_s28 + $0x89] sm:$0xff]  ;;  %v1583_v54 = vld [vmem:[%s4754_s28 + $0x95] sm:$0xff]  ;;  %v1584_v55 = vld [vmem:[%s4754_s28 + $0x9d] sm:$0xff]  ;;  %v308_v56 = vpack.c.bf16 %v4840_v49, %v4837_v48  ;;  %v1614_v57 = vpack.c.bf16 %v1582_v51, %v1581_v50 }
  0x1f   : > { %v309_v58 = vpack.c.bf16 %v4849_v53, %v4846_v52  ;;  %v1615_v59 = vpack.c.bf16 %v1584_v55, %v1583_v54  ;;  %v4861_v60 = vld [vmem:[%s4754_s28 + $0x91] sm:$0xff]  ;;  %v4864_v61 = vld [vmem:[%s4754_s28 + $0x99] sm:$0xff]  ;;  %v1585_v62 = vld [vmem:[%s4754_s28 + $0xa5] sm:$0xff] }
  0x20   : > { %3979 = vmatmul.mubr.msk.bf16.gmra.mrb[4].mxu1 %vm330_vm0, %v304_v32  ;;  %4147 = vmatmul.mubr.msk.bf16.gmra.mrb[4].mxu0 %vm330_vm0, %v1610_v33  ;;  %v1586_v63 = vld [vmem:[%s4754_s28 + $0xad] sm:$0xff]  ;;  %v4870_v0 = vld [vmem:[%s4754_s28 + $0xa1] sm:$0xff]  ;;  %v1929_v3 = vld [vmem:[%s4754_s28 + $0x16] sm:$0xff]  ;;  %v310_v5 = vpack.c.bf16 %v4864_v61, %v4861_v60 }
  0x21   : > { %3982 = vmatprep.mubr.msk.bf16.mxu1 %vm330_vm0, %v305_v34  ;;  %4150 = vmatprep.mubr.msk.bf16.mxu0 %vm330_vm0, %v1611_v35  ;;  %v4873_v2 = vld [vmem:[%s4754_s28 + $0xa9] sm:$0xff]  ;;  %v1930_v4 = vld [vmem:[%s4754_s28 + $0x1e] sm:$0xff]  ;;  %v1616_v6 = vpack.c.bf16 %v1586_v63, %v1585_v62  ;;  %v4885_v9 = vld [vmem:[%s4754_s28 + $0xb1] sm:$0xff] }
  0x22   : > { %v311_v7 = vpack.c.bf16 %v4873_v2, %v4870_v0  ;;  %v1969_v8 = vpack.c.bf16 %v1930_v4, %v1929_v3  ;;  %v4888_v10 = vld [vmem:[%s4754_s28 + $0xb9] sm:$0xff]  ;;  %v1931_v12 = vld [vmem:[%s4754_s28 + $0x26] sm:$0xff]  ;;  %v1932_v13 = vld [vmem:[%s4754_s28 + $0x2e] sm:$0xff] }
  0x23   : > { %v4894_v14 = vld [vmem:[%s4754_s28 + $0xc1] sm:$0xff]  ;;  %v4897_v15 = vld [vmem:[%s4754_s28 + $0xc9] sm:$0xff]  ;;  %v1933_v16 = vld [vmem:[%s4754_s28 + $0x36] sm:$0xff]  ;;  %v312_v19 = vpack.c.bf16 %v4888_v10, %v4885_v9  ;;  %v1970_v20 = vpack.c.bf16 %v1932_v13, %v1931_v12 }
  0x24   : > { %v1934_v17 = vld [vmem:[%s4754_s28 + $0x3e] sm:$0xff]  ;;  %v313_v21 = vpack.c.bf16 %v4897_v15, %v4894_v14  ;;  %v4912_v27 = vld [vmem:[%s4754_s28 + $0xd1] sm:$0xff]  ;;  %v1935_v31 = vld [vmem:[%s4754_s28 + $0x46] sm:$0xff] }
  0x25   : > { %v1971_v22 = vpack.c.bf16 %v1934_v17, %v1933_v16  ;;  %v4908_v26 = vld [vmem:[%s5771_s1 + $0x38] sm:$0xff]   ;;  %v1936_v32 = vld [vmem:[%s4754_s28 + $0x4e] sm:$0xff]  ;;  %v4924_v33 = vld [vmem:[%s4754_s28 + $0xe1] sm:$0xff] }
  0x26   : > { %v4917_v30 = vld [vmem:[%s4754_s28 + $0xd9] sm:$0xff]  ;;  %v4927_v34 = vld [vmem:[%s4754_s28 + $0xe9] sm:$0xff]  ;;  %v4949_v50 = vld [vmem:[%s4754_s28 + $0x101] sm:$0xff] }
  0x27   : > { %v1937_v35 = vld [vmem:[%s4754_s28 + $0x56] sm:$0xff]  ;;  %v1938_v38 = vld [vmem:[%s4754_s28 + $0x5e] sm:$0xff]  ;;  %v314_v39 = vpack.c.bf16 %v4917_v30, %v4912_v27  ;;  %v315_v42 = vpack.c.bf16 %v4927_v34, %v4924_v33  ;;  %v4952_v51 = vld [vmem:[%s4754_s28 + $0x109] sm:$0xff] }
  0x28   : > { %3983 = vmatmul.mubr.msk.bf16.gmra.mrb[8].mxu1 %vm330_vm0, %v306_v44  ;;  %4151 = vmatmul.mubr.msk.bf16.gmra.mrb[8].mxu0 %vm330_vm0, %v1612_v45  ;;  %v1973_v43 = vpack.c.bf16 %v1938_v38, %v1937_v35  ;;  %v4940_v44 = vld [vmem:[%s4754_s28 + $0xf1] sm:$0xff]  ;;  %v4943_v45 = vld [vmem:[%s4754_s28 + $0xf9] sm:$0xff]  ;;  %v1943_v3 = vld [vmem:[%s4754_s28 + $0x86] sm:$0xff] }
  0x29   : > { %3986 = vmatprep.mubr.msk.bf16.mxu1 %vm330_vm0, %v307_v46  ;;  %4154 = vmatprep.mubr.msk.bf16.mxu0 %vm330_vm0, %v1613_v47  ;;  %v1939_v46 = vld [vmem:[%s4754_s28 + $0x66] sm:$0xff]  ;;  %v1940_v47 = vld [vmem:[%s4754_s28 + $0x6e] sm:$0xff]  ;;  %v1941_v54 = vld [vmem:[%s4754_s28 + $0x76] sm:$0xff] }
  0x2a   : > { %v1942_v55 = vld [vmem:[%s4754_s28 + $0x7e] sm:$0xff]  ;;  %v4964_v62 = vld [vmem:[%s4754_s28 + $0x111] sm:$0xff] }
  0x2b   : > { %v4967_v63 = vld [vmem:[%s4754_s28 + $0x119] sm:$0xff]  ;;  %v1944_v4 = vld [vmem:[%s4754_s28 + $0x8e] sm:$0xff] }
  0x2c   : > { %v318_v12 = vpack.c.bf16 %v4967_v63, %v4964_v62  ;;  %v1976_v13 = vpack.c.bf16 %v1944_v4, %v1943_v3  ;;  %v1949_v35 = vld [vmem:[%s4754_s28 + $0xb6] sm:$0xff]  ;;  %v1950_v38 = vld [vmem:[%s4754_s28 + $0xbe] sm:$0xff] }
  0x30   : > { %3987 = vmatmul.mubr.msk.bf16.gmra.mrb[12].mxu1 %vm330_vm0, %v308_v56  ;;  %4155 = vmatmul.mubr.msk.bf16.gmra.mrb[12].mxu0 %vm330_vm0, %v1614_v57  ;;  %v316_v56 = vpack.c.bf16 %v4943_v45, %v4940_v44  ;;  %v1974_v57 = vpack.c.bf16 %v1940_v47, %v1939_v46  ;;  %v201_v46 = vld [vmem:[%s4754_s28 + $0x10] sm:$0xff]  ;;  %v202_v47 = vld [vmem:[%s4754_s28 + $0x18] sm:$0xff] }
  0x31   : > { %3990 = vmatprep.mubr.msk.bf16.mxu1 %vm330_vm0, %v309_v58  ;;  %4158 = vmatprep.mubr.msk.bf16.mxu0 %vm330_vm0, %v1615_v59  ;;  %v317_v58 = vpack.c.bf16 %v4952_v51, %v4949_v50  ;;  %v1975_v59 = vpack.c.bf16 %v1942_v55, %v1941_v54  ;;  %v1951_v54 = vld [vmem:[%s4754_s28 + $0xc6] sm:$0xff]  ;;  %v1952_v55 = vld [vmem:[%s4754_s28 + $0xce] sm:$0xff]  ;;  %v240_v3 = vpack.c.bf16 %v202_v47, %v201_v46 }
  0x32   : > { %v1980_v4 = vpack.c.bf16 %v1952_v55, %v1951_v54  ;;  %v1959_v46 = vld [vmem:[%s4754_s28 + $0x106] sm:$0xff]  ;;  %v1960_v47 = vld [vmem:[%s4754_s28 + $0x10e] sm:$0xff] }
  0x33   : > { %v5061_v54 = vld [vmem:[%s4754_s28 + $0x60] sm:$0xff]  ;;  %v5064_v55 = vld [vmem:[%s4754_s28 + $0x68] sm:$0xff] }
  0x38   : > { %3991 = vmatmul.mubr.msk.bf16.gmra.mrb[16].mxu1 %vm330_vm0, %v310_v5  ;;  %4159 = vmatmul.mubr.msk.bf16.gmra.mrb[16].mxu0 %vm330_vm0, %v1616_v6  ;;  %v4973_v5 = vld [vmem:[%s4754_s28 + $0x121] sm:$0xff]  ;;  %v4976_v6 = vld [vmem:[%s4754_s28 + $0x129] sm:$0xff] }
  0x39   : > { %3994 = vmatprep.mubr.msk.bf16.mxu1 %vm330_vm0, %v311_v7  ;;  %4184 = vmatprep.mubr.msk.bf16.mxu0 %vm330_vm0, %v1969_v8  ;;  %v1945_v7 = vld [vmem:[%s4754_s28 + $0x96] sm:$0xff]  ;;  %v1946_v8 = vld [vmem:[%s4754_s28 + $0x9e] sm:$0xff]  ;;  %v319_v16 = vpack.c.bf16 %v4976_v6, %v4973_v5 }
  0x3a   : > { %v1977_v17 = vpack.c.bf16 %v1946_v8, %v1945_v7 }
  0x40   : > { %3995 = vmatmul.mubr.msk.bf16.gmra.mrb[20].mxu1 %vm330_vm0, %v312_v19  ;;  %4185 = vmatmul.mubr.msk.bf16.vlgmr.msra.gmra.mrb[0].mxu0 %vm330_vm0, %v1970_v20  ;;  %v4988_v19 = vld [vmem:[%s4754_s28 + $0x131] sm:$0xff]  ;;  %v4991_v20 = vld [vmem:[%s4754_s28 + $0x139] sm:$0xff] }
  0x41   : > { %3998 = vmatprep.mubr.msk.bf16.mxu1 %vm330_vm0, %v313_v21  ;;  %4225 = vmatpush3.bf16.msra.mxu0 %v4765_v11  ;;  %v1972_v11 = vpack.c.bf16 %v1936_v32, %v1935_v31  ;;  %5776 = vst [vmem:[#allocation2_spill] sm:$0xff] %v4991_v20  ;;  %v1947_v21 = vld [vmem:[%s4754_s28 + $0xa6] sm:$0xff] }
  0x42   : > { %4188 = vmatprep.mubr.msk.bf16.mxu0 %vm330_vm0, %v1971_v22  ;;  %4266 = vmatprep.subr.bf16.mxu0 %v4908_v26  ;;  %v1948_v22 = vld [vmem:[%s4754_s28 + $0xae] sm:$0xff]  ;;  %v199_v31 = vld [vmem:[%s4754_s28] sm:$0xff] }
  0x43   : > { %v200_v32 = vld [vmem:[%s4754_s28 + $0x8] sm:$0xff] }
  0x48   : > { %3999 = vmatmul.mubr.msk.bf16.gmra.mrb[24].mxu1 %vm330_vm0, %v314_v39  ;;  %4189 = vmatmul.mubr.msk.bf16.gmra.mrb[4].mxu0 %vm330_vm0, %v1972_v11  ;;  %v320_v39 = vpack.c.bf16 %v4991_v20, %v4988_v19  ;;  %v1978_v11 = vpack.c.bf16 %v1948_v22, %v1947_v21  ;;  %v1956_v21 = vld [vmem:[%s4754_s28 + $0xee] sm:$0xff]  ;;  %v5036_v22 = vld [vmem:[%s4754_s28 + $0x40] sm:$0xff] }
  0x49   : > { %4002 = vmatprep.mubr.msk.bf16.mxu1 %vm330_vm0, %v315_v42  ;;  %4192 = vmatprep.mubr.msk.bf16.mxu0 %vm330_vm0, %v1973_v43  ;;  %v239_v42 = vpack.c.bf16 %v200_v32, %v199_v31  ;;  %v1979_v43 = vpack.c.bf16 %v1950_v38, %v1949_v35  ;;  %v5039_v31 = vld [vmem:[%s4754_s28 + $0x48] sm:$0xff]  ;;  %v1958_v32 = vld [vmem:[%s4754_s28 + $0xfe] sm:$0xff] }
  0x4a   : > { %v232_v20 = vld [vmem:[%s4754_s28 + $0x108] sm:$0xff] }
  0x50   : > { %4003 = vmatmul.mubr.msk.bf16.gmra.mrb[28].mxu1 %vm330_vm0, %v316_v56  ;;  %4193 = vmatmul.mubr.msk.bf16.gmra.mrb[8].mxu0 %vm330_vm0, %v1974_v57  ;;  %v203_v56 = vld [vmem:[%s4754_s28 + $0x20] sm:$0xff]  ;;  %v5012_v57 = vld [vmem:[%s4754_s28 + $0x28] sm:$0xff] }
  0x51   : > { %4006 = vmatprep.mubr.msk.bf16.mxu1 %vm330_vm0, %v317_v58  ;;  %4196 = vmatprep.mubr.msk.bf16.mxu0 %vm330_vm0, %v1975_v59  ;;  %v1953_v58 = vld [vmem:[%s4754_s28 + $0xd6] sm:$0xff]  ;;  %v1954_v59 = vld [vmem:[%s4754_s28 + $0xde] sm:$0xff]  ;;  %v241_v7 = vpack.c.bf16 %v5012_v57, %v203_v56 }
  0x52   : > { %v1981_v8 = vpack.c.bf16 %v1954_v59, %v1953_v58  ;;  %v1961_v56 = vld [vmem:[%s4754_s28 + $0x116] sm:$0xff]  ;;  %v1962_v58 = vld [vmem:[%s4754_s28 + $0x11e] sm:$0xff] }
  0x58   : > { %4007 = vmatmul.mubr.msk.bf16.gmra.mrb[32].mxu1 %vm330_vm0, %v318_v12  ;;  %4197 = vmatmul.mubr.msk.bf16.gmra.mrb[12].mxu0 %vm330_vm0, %v1976_v13  ;;  %v5020_v12 = vld [vmem:[%s5771_s1 + $0x18] sm:$0xff]   ;;  %v5026_v13 = vld [vmem:[%s4754_s28 + $0x30] sm:$0xff] }
  0x59   : > { %4010 = vmatprep.mubr.msk.bf16.mxu1 %vm330_vm0, %v319_v16  ;;  %4200 = vmatprep.mubr.msk.bf16.mxu0 %vm330_vm0, %v1977_v17  ;;  %v5029_v16 = vld [vmem:[%s4754_s28 + $0x38] sm:$0xff]  ;;  %v1955_v17 = vld [vmem:[%s4754_s28 + $0xe6] sm:$0xff] }
  0x5a   : > { %v242_v35 = vpack.c.bf16 %v5029_v16, %v5026_v13  ;;  %v1982_v38 = vpack.c.bf16 %v1956_v21, %v1955_v17  ;;  %v5077_v17 = vld [vmem:[%s4754_s28 + $0x78] sm:$0xff]  ;;  %v1963_v21 = vld [vmem:[%s4754_s28 + $0x126] sm:$0xff] }
  0x60   : > { %4011 = vmatmul.mubr.msk.bf16.gmra.mrb[36].mxu1 %vm330_vm0, %v320_v39  ;;  %4201 = vmatmul.mubr.msk.bf16.gmra.mrb[16].mxu0 %vm330_vm0, %v1978_v11  ;;  %v243_v39 = vpack.c.bf16 %v5039_v31, %v5036_v22 }
  0x61   : > { %4016 = vmatprep.mubr.msk.bf16.mxu1 %vm330_vm0, %v239_v42  ;;  %4204 = vmatprep.mubr.msk.bf16.mxu0 %vm330_vm0, %v1979_v43  ;;  %v5052_v42 = vld [vmem:[%s4754_s28 + $0x50] sm:$0xff]  ;;  %v5055_v43 = vld [vmem:[%s4754_s28 + $0x58] sm:$0xff] }
  0x62   : > { %v244_v59 = vpack.c.bf16 %v5055_v43, %v5052_v42 }
  0x68   : > { %4017 = vmatmul.mubr.msk.bf16.vlgmr.msra.gmra.mrb[0].mxu1 %vm330_vm0, %v240_v3  ;;  %4205 = vmatmul.mubr.msk.bf16.gmra.mrb[20].mxu0 %vm330_vm0, %v1980_v4  ;;  %v1984_v3 = vpack.c.bf16 %v1960_v47, %v1959_v46  ;;  %v245_v4 = vpack.c.bf16 %v5064_v55, %v5061_v54 }
  0x69   : > { %4057 = vmatpush3.bf16.msra.mxu1 %v4782_v23  ;;  %4020 = vmatprep.mubr.msk.bf16.mxu1 %vm330_vm0, %v241_v7  ;;  %v1957_v23 = vld [vmem:[%s4754_s28 + $0xf6] sm:$0xff]  ;;  %v1985_v7 = vpack.c.bf16 %v1962_v58, %v1961_v56 }
  0x6a   : > { %4208 = vmatprep.mubr.msk.bf16.mxu0 %vm330_vm0, %v1981_v8  ;;  %4098 = vmatprep.subr.bf16.mxu1 %v5020_v12  ;;  %v1983_v11 = vpack.c.bf16 %v1958_v32, %v1957_v23  ;;  %v213_v8 = vld [vmem:[%s4754_s28 + $0x70] sm:$0xff]  ;;  %v5083_v32 = vld [vmem:[%s4754_s28 + $0x80] sm:$0xff] }
  0x6b   : > { %v1964_v23 = vld [vmem:[%s4754_s28 + $0x12e] sm:$0xff] }
  0x6c   : > { %v1986_v46 = vpack.c.bf16 %v1964_v23, %v1963_v21  ;;  %v217_v58 = vld [vmem:[%s4754_s28 + $0x90] sm:$0xff]  ;;  %v220_v21 = vld [vmem:[%s4754_s28 + $0xa8] sm:$0xff] }
  0x70   : > { %4021 = vmatmul.mubr.msk.bf16.gmra.mrb[4].mxu1 %vm330_vm0, %v242_v35  ;;  %4209 = vmatmul.mubr.msk.bf16.gmra.mrb[24].mxu0 %vm330_vm0, %v1982_v38  ;;  %v5086_v35 = vld [vmem:[%s4754_s28 + $0x88] sm:$0xff]  ;;  %v1965_v38 = vld [vmem:[%s4754_s28 + $0x136] sm:$0xff] }
  0x71   : > { %4024 = vmatprep.mubr.msk.bf16.mxu1 %vm330_vm0, %v243_v39  ;;  %4212 = vmatprep.mubr.msk.bf16.mxu0 %vm330_vm0, %v1983_v11  ;;  %v1966_v39 = vld [vmem:[%s4754_s28 + $0x13e] sm:$0xff]  ;;  %v246_v11 = vpack.c.bf16 %v5077_v17, %v213_v8  ;;  %v247_v47 = vpack.c.bf16 %v5086_v35, %v5083_v32 }
  0x72   : > { %v1987_v56 = vpack.c.bf16 %v1966_v39, %v1965_v38 }
  0x78   : > { %4025 = vmatmul.mubr.msk.bf16.gmra.mrb[8].mxu1 %vm330_vm0, %v244_v59  ;;  %4213 = vmatmul.mubr.msk.bf16.gmra.mrb[28].mxu0 %vm330_vm0, %v1984_v3  ;;  %v5098_v59 = vld [vmem:[%s4754_s28 + $0x98] sm:$0xff]  ;;  %v1967_v3 = vld [vmem:[%s4754_s28 + $0x146] sm:$0xff] }
  0x79   : > { %4028 = vmatprep.mubr.msk.bf16.mxu1 %vm330_vm0, %v245_v4  ;;  %4216 = vmatprep.mubr.msk.bf16.mxu0 %vm330_vm0, %v1985_v7  ;;  %v1968_v4 = vld [vmem:[%s4754_s28 + $0x14e] sm:$0xff]  ;;  %v219_v7 = vld [vmem:[%s4754_s28 + $0xa0] sm:$0xff]  ;;  %v248_v23 = vpack.c.bf16 %v5098_v59, %v217_v58 }
  0x7a   : > { %v1988_v38 = vpack.c.bf16 %v1968_v4, %v1967_v3  ;;  %v249_v39 = vpack.c.bf16 %v220_v21, %v219_v7  ;;  %v224_v3 = vld [vmem:[%s4754_s28 + $0xc8] sm:$0xff] }
  0x80   : > { %4029 = vmatmul.mubr.msk.bf16.gmra.mrb[12].mxu1 %vm330_vm0, %v246_v11  ;;  %4217 = vmatmul.mubr.msk.bf16.gmra.mrb[32].mxu0 %vm330_vm0, %v1986_v46  ;;  %v2331_v11 = vpack.c.bf16 %v5026_v13, %v5012_v57  ;;  %v221_v46 = vld [vmem:[%s4754_s28 + $0xb0] sm:$0xff]  ;;  %v2332_v57 = vpack.c.bf16 %v5036_v22, %v5029_v16  ;;  %v227_v16 = vld [vmem:[%s4754_s28 + $0xe0] sm:$0xff]  ;;  %v228_v22 = vld [vmem:[%s4754_s28 + $0xe8] sm:$0xff] }
  0x81   : > { %4032 = vmatprep.mubr.msk.bf16.mxu1 %vm330_vm0, %v247_v47  ;;  %4220 = vmatprep.mubr.msk.bf16.mxu0 %vm330_vm0, %v1987_v56  ;;  %v222_v47 = vld [vmem:[%s4754_s28 + $0xb8] sm:$0xff]  ;;  %v223_v56 = vld [vmem:[%s4754_s28 + $0xc0] sm:$0xff] }
  0x82   : > { %v250_v4 = vpack.c.bf16 %v222_v47, %v221_v46  ;;  %v251_v13 = vpack.c.bf16 %v224_v3, %v223_v56 }
  0x88   : > { %4033 = vmatmul.mubr.msk.bf16.gmra.mrb[16].mxu1 %vm330_vm0, %v248_v23  ;;  %4221 = vmatmul.mubr.msk.bf16.gmra.mrb[36].mxu0 %vm330_vm0, %v1988_v38  ;;  %v2333_v23 = vpack.c.bf16 %v5052_v42, %v5039_v31  ;;  %v5123_v38 = vld [vmem:[%s5771_s1 + $0x40] sm:$0xff]   ;;  %v2334_v42 = vpack.c.bf16 %v5061_v54, %v5055_v43  ;;  %v2336_v54 = vpack.c.bf16 %v5083_v32, %v5077_v17 }
  0x89   : > { %4036 = vmatprep.mubr.msk.bf16.mxu1 %vm330_vm0, %v249_v39  ;;  %4226 = vmatprep.mubr.msk.bf16.mxu0 %vm330_vm0, %v2331_v11  ;;  %v225_v39 = vld [vmem:[%s4754_s28 + $0xd0] sm:$0xff]  ;;  %v226_v11 = vld [vmem:[%s4754_s28 + $0xd8] sm:$0xff]  ;;  %v2338_v32 = vpack.c.bf16 %v219_v7, %v5098_v59  ;;  %v2340_v7 = vpack.c.bf16 %v223_v56, %v222_v47 }
  0x8a   : > { %v252_v31 = vpack.c.bf16 %v226_v11, %v225_v39  ;;  %v2342_v56 = vpack.c.bf16 %v227_v16, %v226_v11  ;;  %v5192_v11 = vld [vmem:[%s4754_s28 + $0x42] sm:$0xff] }
  0x90   : > { %4037 = vmatmul.mubr.msk.bf16.gmra.mrb[20].mxu1 %vm330_vm0, %v250_v4  ;;  %4227 = vmatmul.mubr.msk.bf16.vlgmr.msra.gmra.mrb[0].mxu0 %vm330_vm0, %v2332_v57  ;;  %v253_v4 = vpack.c.bf16 %v228_v22, %v227_v16  ;;  %v2335_v57 = vpack.c.bf16 %v213_v8, %v5064_v55  ;;  %v2337_v8 = vpack.c.bf16 %v217_v58, %v5086_v35  ;;  %v5195_v16 = vld [vmem:[%s4754_s28 + $0x4a] sm:$0xff] }
  0x91   : > { %4040 = vmatprep.mubr.msk.bf16.mxu1 %vm330_vm0, %v251_v13  ;;  %4267 = vmatpush3.bf16.msra.mxu0 %v4908_v26  ;;  %v229_v26 = vld [vmem:[%s4754_s28 + $0xf0] sm:$0xff]  ;;  %v230_v13 = vld [vmem:[%s4754_s28 + $0xf8] sm:$0xff]  ;;  %v2339_v58 = vpack.c.bf16 %v221_v46, %v220_v21  ;;  %v2341_v46 = vpack.c.bf16 %v225_v39, %v224_v3 }
  0x92   : > { %4230 = vmatprep.mubr.msk.bf16.mxu0 %vm330_vm0, %v2333_v23  ;;  %4308 = vmatprep.subr.bf16.mxu0 %v5123_v38  ;;  %v231_v23 = vld [vmem:[%s4754_s28 + $0x100] sm:$0xff]  ;;  %v254_v43 = vpack.c.bf16 %v230_v13, %v229_v26  ;;  %v2343_v39 = vpack.c.bf16 %v229_v26, %v228_v22  ;;  %v887_v26 = vpack.c.bf16 %v5195_v16, %v5192_v11 }
  0x93   : > { %v255_v55 = vpack.c.bf16 %v232_v20, %v231_v23  ;;  %v2344_v22 = vpack.c.bf16 %v231_v23, %v230_v13  ;;  %v5213_v13 = vld [vmem:[%s4754_s28 + $0x62] sm:$0xff] }
  0x98   : > { %4041 = vmatmul.mubr.msk.bf16.gmra.mrb[24].mxu1 %vm330_vm0, %v252_v31  ;;  %4231 = vmatmul.mubr.msk.bf16.gmra.mrb[4].mxu0 %vm330_vm0, %v2334_v42  ;;  %v233_v31 = vld [vmem:[%s4754_s28 + $0x110] sm:$0xff]  ;;  %v234_v42 = vld [vmem:[%s4754_s28 + $0x118] sm:$0xff] }
  0x99   : > { %4044 = vmatprep.mubr.msk.bf16.mxu1 %vm330_vm0, %v253_v4  ;;  %4234 = vmatprep.mubr.msk.bf16.mxu0 %vm330_vm0, %v2335_v57  ;;  %v235_v4 = vld [vmem:[%s4754_s28 + $0x120] sm:$0xff]  ;;  %v236_v57 = vld [vmem:[%s4754_s28 + $0x128] sm:$0xff]  ;;  %v256_v17 = vpack.c.bf16 %v234_v42, %v233_v31 }
  0x9a   : > { %v257_v35 = vpack.c.bf16 %v236_v57, %v235_v4 }
  0xa0   : > { %4045 = vmatmul.mubr.msk.bf16.gmra.mrb[28].mxu1 %vm330_vm0, %v254_v43  ;;  %4235 = vmatmul.mubr.msk.bf16.gmra.mrb[8].mxu0 %vm330_vm0, %v2336_v54  ;;  %v237_v43 = vld [vmem:[%s4754_s28 + $0x130] sm:$0xff]  ;;  %v5163_v54 = vld [vmem:[%s4754_s28 + $0x138] sm:$0xff] }
  0xa1   : > { %4048 = vmatprep.mubr.msk.bf16.mxu1 %vm330_vm0, %v255_v55  ;;  %4238 = vmatprep.mubr.msk.bf16.mxu0 %vm330_vm0, %v2337_v8  ;;  %v843_v55 = vld [vmem:[%s4754_s28 + $0x2] sm:$0xff]  ;;  %v844_v8 = vld [vmem:[%s4754_s28 + $0xa] sm:$0xff]  ;;  %v258_v59 = vpack.c.bf16 %v5163_v54, %v237_v43 }
  0xa2   : > { %v883_v21 = vpack.c.bf16 %v844_v8, %v843_v55  ;;  %v5184_v55 = vld [vmem:[%s4754_s28 + $0x32] sm:$0xff]  ;;  %v5187_v8 = vld [vmem:[%s4754_s28 + $0x3a] sm:$0xff] }
  0xa8   : > { %4049 = vmatmul.mubr.msk.bf16.gmra.mrb[32].mxu1 %vm330_vm0, %v256_v17  ;;  %4239 = vmatmul.mubr.msk.bf16.gmra.mrb[12].mxu0 %vm330_vm0, %v2338_v32  ;;  %v845_v17 = vld [vmem:[%s4754_s28 + $0x12] sm:$0xff]  ;;  %v846_v32 = vld [vmem:[%s4754_s28 + $0x1a] sm:$0xff] }
  0xa9   : > { %4052 = vmatprep.mubr.msk.bf16.mxu1 %vm330_vm0, %v257_v35  ;;  %4242 = vmatprep.mubr.msk.bf16.mxu0 %vm330_vm0, %v2339_v58  ;;  %v847_v35 = vld [vmem:[%s4754_s28 + $0x22] sm:$0xff]  ;;  %v5177_v58 = vld [vmem:[%s4754_s28 + $0x2a] sm:$0xff]  ;;  %v884_v47 = vpack.c.bf16 %v846_v32, %v845_v17  ;;  %v2347_v17 = vpack.c.bf16 %v237_v43, %v236_v57  ;;  %v5226_v32 = vld [vmem:[%s4754_s28 + $0x72] sm:$0xff] }
  0xaa   : > { %v885_v3 = vpack.c.bf16 %v5177_v58, %v847_v35  ;;  %v5229_v35 = vld [vmem:[%s4754_s28 + $0x7a] sm:$0xff]  ;;  %v5237_v57 = vld [vmem:[%s4754_s28 + $0x8a] sm:$0xff] }
  0xab   : > { %v2327_v43 = vld [vmem:[%s4754_s28 + $0x148] sm:$0xff] }
  0xb0   : > { %4053 = vmatmul.mubr.msk.bf16.gmra.mrb[36].mxu1 %vm330_vm0, %v258_v59  ;;  %4243 = vmatmul.mubr.msk.bf16.gmra.mrb[16].mxu0 %vm330_vm0, %v2340_v7  ;;  %v2345_v59 = vpack.c.bf16 %v233_v31, %v232_v20  ;;  %v5206_v7 = vld [vmem:[%s4754_s28 + $0x52] sm:$0xff]  ;;  %v5216_v20 = vld [vmem:[%s4754_s28 + $0x6a] sm:$0xff]  ;;  %v2346_v31 = vpack.c.bf16 %v235_v4, %v234_v42  ;;  %v2326_v42 = vld [vmem:[%s4754_s28 + $0x140] sm:$0xff] }
  0xb1   : > { %4058 = vmatprep.mubr.msk.bf16.mxu1 %vm330_vm0, %v883_v21  ;;  %4246 = vmatprep.mubr.msk.bf16.mxu0 %vm330_vm0, %v2341_v46  ;;  %v5209_v21 = vld [vmem:[%s4754_s28 + $0x5a] sm:$0xff]  ;;  %v889_v46 = vpack.c.bf16 %v5216_v20, %v5213_v13  ;;  %v5234_v4 = vld [vmem:[%s4754_s28 + $0x82] sm:$0xff] }
  0xb2   : > { %v888_v23 = vpack.c.bf16 %v5209_v21, %v5206_v7 }
  0xb8   : > { %4059 = vmatmul.mubr.msk.bf16.vlgmr.msra.gmra.mrb[0].mxu1 %vm330_vm0, %v884_v47  ;;  %4247 = vmatmul.mubr.msk.bf16.gmra.mrb[20].mxu0 %vm330_vm0, %v2342_v56  ;;  %v2328_v47 = vld [vmem:[%s4754_s28 + $0x150] sm:$0xff]  ;;  %v890_v56 = vpack.c.bf16 %v5229_v35, %v5226_v32 }
  0xb9   : > { %4099 = vmatpush3.bf16.msra.mxu1 %v5020_v12  ;;  %4062 = vmatprep.mubr.msk.bf16.mxu1 %vm330_vm0, %v885_v3  ;;  %v886_v12 = vpack.c.bf16 %v5187_v8, %v5184_v55  ;;  %v2348_v3 = vpack.c.bf16 %v2326_v42, %v5163_v54  ;;  %v2330_v54 = vld [vmem:[%s4754_s28 + $0x160] sm:$0xff] }
  0xba   : > { %4250 = vmatprep.mubr.msk.bf16.mxu0 %vm330_vm0, %v2343_v39  ;;  %4350 = vmatprep.subr.bf16.mxu1 %v4738_v1  ;;  %v891_v39 = vpack.c.bf16 %v5237_v57, %v5234_v4 }
  0xc0   : > { %4063 = vmatmul.mubr.msk.bf16.gmra.mrb[4].mxu1 %vm330_vm0, %v886_v12  ;;  %4251 = vmatmul.mubr.msk.bf16.gmra.mrb[24].mxu0 %vm330_vm0, %v2344_v22  ;;  %v2349_v12 = vpack.c.bf16 %v2328_v47, %v2327_v43  ;;  %v5250_v22 = vld [vmem:[%s4754_s28 + $0x92] sm:$0xff]  ;;  %v2693_v43 = vpack.c.bf16 %v4786_v24, %v4772_v18  ;;  %v2694_v24 = vpack.c.bf16 %v4795_v28, %v4789_v25  ;;  %v5306_v25 = vld [vmem:[%s4754_s28 + $0xe2] sm:$0xff]  ;;  %v5309_v28 = vld [vmem:[%s4754_s28 + $0xea] sm:$0xff] }
  0xc1   : > { %4066 = vmatprep.mubr.msk.bf16.mxu1 %vm330_vm0, %v887_v26  ;;  %4254 = vmatprep.mubr.msk.bf16.mxu0 %vm330_vm0, %v2345_v59  ;;  %v5253_v26 = vld [vmem:[%s4754_s28 + $0x9a] sm:$0xff]  ;;  %v5274_v47 = vld [vmem:[%s4754_s28 + $0xb2] sm:$0xff] }
  0xc2   : > { %v2329_v59 = vld [vmem:[%s4754_s28 + $0x158] sm:$0xff] }
  0xc8   : > { %4067 = vmatmul.mubr.msk.bf16.gmra.mrb[8].mxu1 %vm330_vm0, %v888_v23  ;;  %4255 = vmatmul.mubr.msk.bf16.gmra.mrb[28].mxu0 %vm330_vm0, %v2346_v31  ;;  %v5259_v23 = vld [vmem:[%s4754_s28 + $0xa2] sm:$0xff]  ;;  %v5262_v31 = vld [vmem:[%s4754_s28 + $0xaa] sm:$0xff] }
  0xc9   : > { %4070 = vmatprep.mubr.msk.bf16.mxu1 %vm330_vm0, %v889_v46  ;;  %4258 = vmatprep.mubr.msk.bf16.mxu0 %vm330_vm0, %v2347_v17  ;;  %v892_v46 = vpack.c.bf16 %v5253_v26, %v5250_v22  ;;  %v2350_v17 = vpack.c.bf16 %v2330_v54, %v2329_v59  ;;  %v893_v42 = vpack.c.bf16 %v5262_v31, %v5259_v23  ;;  %v5298_v54 = vld [vmem:[%s4754_s28 + $0xd2] sm:$0xff] }
  0xca   : > { %v2695_v59 = vpack.c.bf16 %v4813_v36, %v4798_v29  ;;  %v2696_v36 = vpack.c.bf16 %v4822_v40, %v4816_v37  ;;  %v5330_v37 = vld [vmem:[%s4754_s28 + $0x102] sm:$0xff]  ;;  %v5333_v40 = vld [vmem:[%s4754_s28 + $0x10a] sm:$0xff] }
  0xd0   : > { %4071 = vmatmul.mubr.msk.bf16.gmra.mrb[12].mxu1 %vm330_vm0, %v890_v56  ;;  %4259 = vmatmul.mubr.msk.bf16.gmra.mrb[32].mxu0 %vm330_vm0, %v2348_v3  ;;  %v5277_v56 = vld [vmem:[%s4754_s28 + $0xba] sm:$0xff]  ;;  %v5281_v3 = vld [vmem:[%s4754_s28 + $0xc2] sm:$0xff] }
  0xd1   : > { %4074 = vmatprep.mubr.msk.bf16.mxu1 %vm330_vm0, %v891_v39  ;;  %4262 = vmatprep.mubr.msk.bf16.mxu0 %vm330_vm0, %v2349_v12  ;;  %v5284_v39 = vld [vmem:[%s4754_s28 + $0xca] sm:$0xff]  ;;  %v894_v18 = vpack.c.bf16 %v5277_v56, %v5274_v47 }
  0xd2   : > { %v895_v12 = vpack.c.bf16 %v5284_v39, %v5281_v3 }
  0xd8   : > { %4075 = vmatmul.mubr.msk.bf16.gmra.mrb[16].mxu1 %vm330_vm0, %v892_v46  ;;  %4263 = vmatmul.mubr.msk.bf16.gmra.mrb[36].mxu0 %vm330_vm0, %v2350_v17  ;;  %v5301_v46 = vld [vmem:[%s4754_s28 + $0xda] sm:$0xff]  ;;  %v897_v17 = vpack.c.bf16 %v5309_v28, %v5306_v25 }
  0xd9   : > { %4078 = vmatprep.mubr.msk.bf16.mxu1 %vm330_vm0, %v893_v42  ;;  %4268 = vmatprep.mubr.msk.bf16.mxu0 %vm330_vm0, %v2693_v43  ;;  %v896_v29 = vpack.c.bf16 %v5301_v46, %v5298_v54  ;;  %v2697_v42 = vpack.c.bf16 %v4837_v48, %v4825_v41  ;;  %v5326_v43 = vld [vmem:[%s4754_s28 + $0xfa] sm:$0xff]  ;;  %v2698_v48 = vpack.c.bf16 %v4846_v52, %v4840_v49  ;;  %v5354_v49 = vld [vmem:[%s4754_s28 + $0x122] sm:$0xff]  ;;  %v5357_v52 = vld [vmem:[%s4754_s28 + $0x12a] sm:$0xff] }
  0xe0   : > { %4079 = vmatmul.mubr.msk.bf16.gmra.mrb[20].mxu1 %vm330_vm0, %v894_v18  ;;  %4269 = vmatmul.mubr.msk.bf16.vlgmr.msra.gmra.mrb[0].mxu0 %vm330_vm0, %v2694_v24  ;;  %v899_v18 = vpack.c.bf16 %v5333_v40, %v5330_v37  ;;  %v2699_v24 = vpack.c.bf16 %v4861_v60, %v4849_v53  ;;  %v2700_v60 = vpack.c.bf16 %v4870_v0, %v4864_v61  ;;  %v1205_v61 = vld [vmem:[%s4754_s28 + $0x14] sm:$0xff]  ;;  %v1206_v0 = vld [vmem:[%s4754_s28 + $0x1c] sm:$0xff] }
  0xe1   : > { %4082 = vmatprep.mubr.msk.bf16.mxu1 %vm330_vm0, %v895_v12  ;;  %4309 = vmatpush3.bf16.msra.mxu0 %v5123_v38  ;;  %v5323_v38 = vld [vmem:[%s4754_s28 + $0xf2] sm:$0xff] }
  0xe2   : > { %4272 = vmatprep.mubr.msk.bf16.mxu0 %vm330_vm0, %v2695_v59  ;;  %v898_v41 = vpack.c.bf16 %v5326_v43, %v5323_v38  ;;  %v5347_v12 = vld [vmem:[%s4754_s28 + $0x112] sm:$0xff]  ;;  %v5350_v59 = vld [vmem:[%s4754_s28 + $0x11a] sm:$0xff] }
  0xe3   : > { %v900_v53 = vpack.c.bf16 %v5350_v59, %v5347_v12 }
  0xe8   : > { %4083 = vmatmul.mubr.msk.bf16.gmra.mrb[24].mxu1 %vm330_vm0, %v896_v29  ;;  %4273 = vmatmul.mubr.msk.bf16.gmra.mrb[4].mxu0 %vm330_vm0, %v2696_v36  ;;  %v901_v29 = vpack.c.bf16 %v5357_v52, %v5354_v49  ;;  %v2701_v36 = vpack.c.bf16 %v4885_v9, %v4873_v2  ;;  %v2702_v9 = vpack.c.bf16 %v4894_v14, %v4888_v10  ;;  %v1210_v10 = vld [vmem:[%s4754_s28 + $0x3c] sm:$0xff] }
  0xe9   : > { %4086 = vmatprep.mubr.msk.bf16.mxu1 %vm330_vm0, %v897_v17  ;;  %4276 = vmatprep.mubr.msk.bf16.mxu0 %vm330_vm0, %v2697_v42  ;;  %v5371_v17 = vld [vmem:[%s4754_s28 + $0x132] sm:$0xff]  ;;  %v5374_v42 = vld [vmem:[%s4754_s28 + $0x13a] sm:$0xff] }
  0xea   : > { %v902_v2 = vpack.c.bf16 %v5374_v42, %v5371_v17 }
  0xf0   : > { %4087 = vmatmul.mubr.msk.bf16.gmra.mrb[28].mxu1 %vm330_vm0, %v898_v41  ;;  %4277 = vmatmul.mubr.msk.bf16.gmra.mrb[8].mxu0 %vm330_vm0, %v2698_v48  ;;  %v1245_v41 = vpack.c.bf16 %v1206_v0, %v1205_v61  ;;  %v2703_v48 = vpack.c.bf16 %v4912_v27, %v4897_v15  ;;  %v2704_v15 = vpack.c.bf16 %v4924_v33, %v4917_v30  ;;  %v1213_v30 = vld [vmem:[%s4754_s28 + $0x54] sm:$0xff]  ;;  %v1214_v33 = vld [vmem:[%s4754_s28 + $0x5c] sm:$0xff]  ;;  %v1215_v0 = vld [vmem:[%s4754_s28 + $0x64] sm:$0xff] }
  0xf1   : > { %4090 = vmatprep.mubr.msk.bf16.mxu1 %vm330_vm0, %v899_v18  ;;  %4280 = vmatprep.mubr.msk.bf16.mxu0 %vm330_vm0, %v2699_v24  ;;  %v1207_v18 = vld [vmem:[%s4754_s28 + $0x24] sm:$0xff]  ;;  %v1208_v24 = vld [vmem:[%s4754_s28 + $0x2c] sm:$0xff] }
  0xf2   : > { %v1246_v14 = vpack.c.bf16 %v1208_v24, %v1207_v18  ;;  %v1220_v18 = vld [vmem:[%s4754_s28 + $0x8c] sm:$0xff]  ;;  %v2688_v24 = vld [vmem:[%s4754_s28 + $0x141] sm:$0xff] }
  0xf8   : > { %4091 = vmatmul.mubr.msk.bf16.gmra.mrb[32].mxu1 %vm330_vm0, %v900_v53  ;;  %4281 = vmatmul.mubr.msk.bf16.gmra.mrb[12].mxu0 %vm330_vm0, %v2700_v60  ;;  %v1209_v53 = vld [vmem:[%s4754_s28 + $0x34] sm:$0xff]  ;;  %v2705_v60 = vpack.c.bf16 %v4940_v44, %v4927_v34  ;;  %v2706_v34 = vpack.c.bf16 %v4949_v50, %v4943_v45  ;;  %v1249_v44 = vpack.c.bf16 %v1214_v33, %v1213_v30  ;;  %v1218_v50 = vld [vmem:[%s4754_s28 + $0x7c] sm:$0xff] }
  0xf9   : > { %4094 = vmatprep.mubr.msk.bf16.mxu1 %vm330_vm0, %v901_v29  ;;  %4284 = vmatprep.mubr.msk.bf16.mxu0 %vm330_vm0, %v2701_v36  ;;  %v1247_v27 = vpack.c.bf16 %v1210_v10, %v1209_v53  ;;  %v1211_v29 = vld [vmem:[%s4754_s28 + $0x44] sm:$0xff]  ;;  %v1212_v36 = vld [vmem:[%s4754_s28 + $0x4c] sm:$0xff]  ;;  %v1217_v45 = vld [vmem:[%s4754_s28 + $0x74] sm:$0xff] }
  0xfa   : > { %v1248_v61 = vpack.c.bf16 %v1212_v36, %v1211_v29  ;;  %v5777_v10 = vld [vmem:[#allocation2_spill] sm:$0xff]  ;;  %v1224_v29 = vld [vmem:[%s4754_s28 + $0xac] sm:$0xff]  ;;  %v1225_v33 = vld [vmem:[%s4754_s28 + $0xb4] sm:$0xff] }
  0xfb   : > { %v2691_v36 = vld [vmem:[%s4754_s28 + $0x159] sm:$0xff]  ;;  %v2692_v30 = vld [vmem:[%s4754_s28 + $0x161] sm:$0xff] }
 0x100   : > { %4095 = vmatmul.mubr.msk.bf16.gmra.mrb[36].mxu1 %vm330_vm0, %v902_v2  ;;  %4285 = vmatmul.mubr.msk.bf16.gmra.mrb[16].mxu0 %vm330_vm0, %v2702_v9  ;;  %v1216_v2 = vld [vmem:[%s4754_s28 + $0x6c] sm:$0xff]  ;;  %v1251_v9 = vpack.c.bf16 %v1218_v50, %v1217_v45  ;;  %v1229_v50 = vld [vmem:[%s4754_s28 + $0xd4] sm:$0xff] }
 0x101   : > { %4100 = vmatprep.mubr.msk.bf16.mxu1 %vm330_vm0, %v1245_v41  ;;  %4288 = vmatprep.mubr.msk.bf16.mxu0 %vm330_vm0, %v2703_v48  ;;  %v2709_v41 = vpack.c.bf16 %v4988_v19, %v4976_v6  ;;  %v1219_v48 = vld [vmem:[%s4754_s28 + $0x84] sm:$0xff]  ;;  %v2690_v19 = vld [vmem:[%s4754_s28 + $0x151] sm:$0xff] }
 0x102   : > { %v2689_v6 = vld [vmem:[%s4754_s28 + $0x149] sm:$0xff]  ;;  %v1252_v53 = vpack.c.bf16 %v1220_v18, %v1219_v48  ;;  %v1233_v18 = vld [vmem:[%s4754_s28 + $0xf4] sm:$0xff] }
 0x103   : > { %v1228_v45 = vld [vmem:[%s4754_s28 + $0xcc] sm:$0xff] }
 0x104   : > { %v1232_v48 = vld [vmem:[%s4754_s28 + $0xec] sm:$0xff] }
 0x108   : > { %4101 = vmatmul.mubr.msk.bf16.vlgmr.msra.gmra.mrb[0].mxu1 %vm330_vm0, %v1246_v14  ;;  %4289 = vmatmul.mubr.msk.bf16.gmra.mrb[20].mxu0 %vm330_vm0, %v2704_v15  ;;  %v2710_v14 = vpack.c.bf16 %v2688_v24, %v5777_v10  ;;  %v3059_v24 = vpack.c.bf16 %v5226_v32, %v5216_v20  ;;  %v3060_v20 = vpack.c.bf16 %v5234_v4, %v5229_v35  ;;  %v1240_v10 = vld [vmem:[%s4754_s28 + $0x12c] sm:$0xff]  ;;  %v1242_v35 = vld [vmem:[%s4754_s28 + $0x13c] sm:$0xff] }
 0x109   : > { %4351 = vmatpush3.bf16.msra.mxu1 %v4738_v1  ;;  %4104 = vmatprep.mubr.msk.bf16.mxu1 %vm330_vm0, %v1247_v27  ;;  %v2707_v1 = vpack.c.bf16 %v4964_v62, %v4952_v51  ;;  %v1250_v51 = vpack.c.bf16 %v1216_v2, %v1215_v0  ;;  %v2708_v62 = vpack.c.bf16 %v4973_v5, %v4967_v63  ;;  %v1221_v63 = vld [vmem:[%s4754_s28 + $0x94] sm:$0xff]  ;;  %v1222_v5 = vld [vmem:[%s4754_s28 + $0x9c] sm:$0xff]  ;;  %v1227_v2 = vld [vmem:[%s4754_s28 + $0xc4] sm:$0xff] }
 0x10a   : > { %4292 = vmatprep.mubr.msk.bf16.mxu0 %vm330_vm0, %v2705_v60  ;;  %v1253_v15 = vpack.c.bf16 %v1222_v5, %v1221_v63  ;;  %v2711_v27 = vpack.c.bf16 %v2690_v19, %v2689_v6  ;;  %v1223_v60 = vld [vmem:[%s4754_s28 + $0xa4] sm:$0xff]  ;;  %v3055_v0 = vpack.c.bf16 %v5184_v55, %v5177_v58  ;;  %v3056_v58 = vpack.c.bf16 %v5192_v11, %v5187_v8  ;;  %v1234_v8 = vld [vmem:[%s4754_s28 + $0xfc] sm:$0xff]  ;;  %v1236_v5 = vld [vmem:[%s4754_s28 + $0x10c] sm:$0xff] }
 0x10b   : > { %v1235_v63 = vld [vmem:[%s4754_s28 + $0x104] sm:$0xff]  ;;  %v1237_v6 = vld [vmem:[%s4754_s28 + $0x114] sm:$0xff]  ;;  %v3061_v19 = vpack.c.bf16 %v5250_v22, %v5237_v57  ;;  %v3062_v57 = vpack.c.bf16 %v5259_v23, %v5253_v26 }
 0x10c   : > { %v1588_v26 = vld [vmem:[%s4754_s28 + $0xbd] sm:$0xff] }
 0x110   : > { %4105 = vmatmul.mubr.msk.bf16.gmra.mrb[4].mxu1 %vm330_vm0, %v1248_v61  ;;  %4293 = vmatmul.mubr.msk.bf16.gmra.mrb[24].mxu0 %vm330_vm0, %v2706_v34  ;;  %v1226_v61 = vld [vmem:[%s4754_s28 + $0xbc] sm:$0xff]  ;;  %v1254_v34 = vpack.c.bf16 %v1224_v29, %v1223_v60  ;;  %v1244_v60 = vld [vmem:[%s4754_s28 + $0x14c] sm:$0xff] }
 0x111   : > { %4108 = vmatprep.mubr.msk.bf16.mxu1 %vm330_vm0, %v1249_v44  ;;  %4296 = vmatprep.mubr.msk.bf16.mxu0 %vm330_vm0, %v2707_v1  ;;  %v2712_v44 = vpack.c.bf16 %v2692_v30, %v2691_v36  ;;  %v1255_v1 = vpack.c.bf16 %v1226_v61, %v1225_v33  ;;  %v1587_v29 = vld [vmem:[%s4754_s28 + $0xb5] sm:$0xff]  ;;  %v3065_v36 = vpack.c.bf16 %v5298_v54, %v5284_v39  ;;  %v1589_v30 = vld [vmem:[%s4754_s28 + $0xc5] sm:$0xff]  ;;  %v1590_v33 = vld [vmem:[%s4754_s28 + $0xcd] sm:$0xff] }
 0x112   : > { %v1591_v61 = vld [vmem:[%s4754_s28 + $0xd5] sm:$0xff]  ;;  %v3066_v39 = vpack.c.bf16 %v5306_v25, %v5301_v46  ;;  %v1596_v46 = vld [vmem:[%s4754_s28 + $0xfd] sm:$0xff] }
 0x118   : > { %4109 = vmatmul.mubr.msk.bf16.gmra.mrb[8].mxu1 %vm330_vm0, %v1250_v51  ;;  %4297 = vmatmul.mubr.msk.bf16.gmra.mrb[28].mxu0 %vm330_vm0, %v2708_v62  ;;  %v1230_v51 = vld [vmem:[%s4754_s28 + $0xdc] sm:$0xff]  ;;  %v1256_v62 = vpack.c.bf16 %v1228_v45, %v1227_v2  ;;  %v3069_v2 = vpack.c.bf16 %v5347_v12, %v5333_v40  ;;  %v1597_v45 = vld [vmem:[%s4754_s28 + $0x105] sm:$0xff]  ;;  %v3070_v12 = vpack.c.bf16 %v5354_v49, %v5350_v59 }
 0x119   : > { %4112 = vmatprep.mubr.msk.bf16.mxu1 %vm330_vm0, %v1251_v9  ;;  %4300 = vmatprep.mubr.msk.bf16.mxu0 %vm330_vm0, %v2709_v41  ;;  %v1257_v55 = vpack.c.bf16 %v1230_v51, %v1229_v50  ;;  %v3057_v9 = vpack.c.bf16 %v5206_v7, %v5195_v16  ;;  %v1231_v41 = vld [vmem:[%s4754_s28 + $0xe4] sm:$0xff]  ;;  %v3058_v16 = vpack.c.bf16 %v5213_v13, %v5209_v21  ;;  %v1238_v21 = vld [vmem:[%s4754_s28 + $0x11c] sm:$0xff]  ;;  %v1598_v50 = vld [vmem:[%s4754_s28 + $0x10d] sm:$0xff] }
 0x11a   : > { %v1258_v11 = vpack.c.bf16 %v1232_v48, %v1231_v41  ;;  %v1259_v7 = vpack.c.bf16 %v1234_v8, %v1233_v18  ;;  %v1260_v13 = vpack.c.bf16 %v1236_v5, %v1235_v63  ;;  %v1261_v32 = vpack.c.bf16 %v1238_v21, %v1237_v6  ;;  %v1603_v59 = vld [vmem:[%s4754_s28 + $0x135] sm:$0xff]  ;;  %v1604_v49 = vld [vmem:[%s4754_s28 + $0x13d] sm:$0xff]  ;;  %v3051_v41 = vld [vmem:[%s4754_s28 + $0x14a] sm:$0xff] }
 0x11b   : > { %v1622_v40 = vpack.c.bf16 %v1598_v50, %v1597_v45  ;;  %v3052_v48 = vld [vmem:[%s4754_s28 + $0x152] sm:$0xff]  ;;  %v1625_v18 = vpack.c.bf16 %v1604_v49, %v1603_v59 }
 0x11c   : > { %v3073_v8 = vpack.c.bf16 %v3052_v48, %v3051_v41 }
 0x120   : > { %4113 = vmatmul.mubr.msk.bf16.gmra.mrb[12].mxu1 %vm330_vm0, %v1252_v53  ;;  %4301 = vmatmul.mubr.msk.bf16.gmra.mrb[32].mxu0 %vm330_vm0, %v2710_v14  ;;  %v1239_v53 = vld [vmem:[%s4754_s28 + $0x124] sm:$0xff]  ;;  %v1241_v14 = vld [vmem:[%s4754_s28 + $0x134] sm:$0xff] }
 0x121   : > { %4116 = vmatprep.mubr.msk.bf16.mxu1 %vm330_vm0, %v1253_v15  ;;  %4304 = vmatprep.mubr.msk.bf16.mxu0 %vm330_vm0, %v2711_v27  ;;  %v1262_v4 = vpack.c.bf16 %v1240_v10, %v1239_v53  ;;  %v1263_v22 = vpack.c.bf16 %v1242_v35, %v1241_v14  ;;  %v3063_v15 = vpack.c.bf16 %v5274_v47, %v5262_v31  ;;  %v1243_v27 = vld [vmem:[%s4754_s28 + $0x144] sm:$0xff] }
 0x122   : > { %v1264_v23 = vpack.c.bf16 %v1244_v60, %v1243_v27  ;;  %v3064_v31 = vpack.c.bf16 %v5281_v3, %v5277_v56  ;;  %v1617_v47 = vpack.c.bf16 %v1588_v26, %v1587_v29  ;;  %v1592_v56 = vld [vmem:[%s4754_s28 + $0xdd] sm:$0xff]  ;;  %v1618_v3 = vpack.c.bf16 %v1590_v33, %v1589_v30 }
 0x123   : > { %v1619_v54 = vpack.c.bf16 %v1592_v56, %v1591_v61  ;;  %v5591_v33 = vld [vmem:[%s5773_s3] ss:$0 sm:$0xff] }
 0x128   : > { %4117 = vmatmul.mubr.msk.bf16.gmra.mrb[16].mxu1 %vm330_vm0, %v1254_v34  ;;  %4305 = vmatmul.mubr.msk.bf16.gmra.mrb[36].mxu0 %vm330_vm0, %v2712_v44  ;;  %v3067_v34 = vpack.c.bf16 %v5323_v38, %v5309_v28  ;;  %v1593_v44 = vld [vmem:[%s4754_s28 + $0xe5] sm:$0xff]  ;;  %v3068_v28 = vpack.c.bf16 %v5330_v37, %v5326_v43  ;;  %v1599_v43 = vld [vmem:[%s4754_s28 + $0x115] sm:$0xff]  ;;  %v1600_v37 = vld [vmem:[%s4754_s28 + $0x11d] sm:$0xff] }
 0x129   : > { %4120 = vmatprep.mubr.msk.bf16.mxu1 %vm330_vm0, %v1255_v1  ;;  %4310 = vmatprep.mubr.msk.bf16.mxu0 %vm330_vm0, %v3055_v0  ;;  %v1594_v1 = vld [vmem:[%s4754_s28 + $0xed] sm:$0xff]  ;;  %v1595_v0 = vld [vmem:[%s4754_s28 + $0xf5] sm:$0xff]  ;;  %v1623_v51 = vpack.c.bf16 %v1600_v37, %v1599_v43 }
 0x12a   : > { %v1620_v25 = vpack.c.bf16 %v1594_v1, %v1593_v44  ;;  %v1621_v38 = vpack.c.bf16 %v1596_v46, %v1595_v0 }
 0x130   : > { %4121 = vmatmul.mubr.msk.bf16.gmra.mrb[20].mxu1 %vm330_vm0, %v1256_v62  ;;  %4311 = vmatmul.mubr.msk.bf16.vlgmr.msra.gmra.mrb[0].mxu0 %vm330_vm0, %v3056_v58  ;;  %v3071_v62 = vpack.c.bf16 %v5371_v17, %v5357_v52  ;;  %v1601_v58 = vld [vmem:[%s4754_s28 + $0x125] sm:$0xff] }
 0x131   : > { %4124 = vmatprep.mubr.msk.bf16.mxu1 %vm330_vm0, %v1257_v55  ;;  %4314 = vmatprep.mubr.msk.bf16.mxu0 %vm330_vm0, %v3057_v9  ;;  %v1602_v55 = vld [vmem:[%s4754_s28 + $0x12d] sm:$0xff]  ;;  %v3050_v9 = vld [vmem:[%s4754_s28 + $0x142] sm:$0xff] }
 0x132   : > { %v1624_v52 = vpack.c.bf16 %v1602_v55, %v1601_v58  ;;  %v3072_v17 = vpack.c.bf16 %v3050_v9, %v5374_v42 }
 0x138   : > { %4125 = vmatmul.mubr.msk.bf16.gmra.mrb[24].mxu1 %vm330_vm0, %v1258_v11  ;;  %4315 = vmatmul.mubr.msk.bf16.gmra.mrb[4].mxu0 %vm330_vm0, %v3058_v16  ;;  %v1605_v11 = vld [vmem:[%s4754_s28 + $0x145] sm:$0xff]  ;;  %v1606_v16 = vld [vmem:[%s4754_s28 + $0x14d] sm:$0xff] }
 0x139   : > { %4128 = vmatprep.mubr.msk.bf16.mxu1 %vm330_vm0, %v1259_v7  ;;  %4318 = vmatprep.mubr.msk.bf16.mxu0 %vm330_vm0, %v3059_v24  ;;  %v3053_v7 = vld [vmem:[%s4754_s28 + $0x15a] sm:$0xff]  ;;  %v3054_v24 = vld [vmem:[%s4754_s28 + $0x162] sm:$0xff]  ;;  %v1626_v63 = vpack.c.bf16 %v1606_v16, %v1605_v11 }
 0x13a   : > { %v3074_v5 = vpack.c.bf16 %v3054_v24, %v3053_v7 }
 0x140   : > { %4129 = vmatmul.mubr.msk.bf16.gmra.mrb[28].mxu1 %vm330_vm0, %v1260_v13  ;;  %4319 = vmatmul.mubr.msk.bf16.gmra.mrb[8].mxu0 %vm330_vm0, %v3060_v20 }
 0x141   : > { %4132 = vmatprep.mubr.msk.bf16.mxu1 %vm330_vm0, %v1261_v32  ;;  %4322 = vmatprep.mubr.msk.bf16.mxu0 %vm330_vm0, %v3061_v19 }
 0x148   : > { %4133 = vmatmul.mubr.msk.bf16.gmra.mrb[32].mxu1 %vm330_vm0, %v1262_v4  ;;  %4323 = vmatmul.mubr.msk.bf16.gmra.mrb[12].mxu0 %vm330_vm0, %v3062_v57 }
 0x149   : > { %4136 = vmatprep.mubr.msk.bf16.mxu1 %vm330_vm0, %v1263_v22  ;;  %4326 = vmatprep.mubr.msk.bf16.mxu0 %vm330_vm0, %v3063_v15 }
 0x150   : > { %4137 = vmatmul.mubr.msk.bf16.gmra.mrb[36].mxu1 %vm330_vm0, %v1264_v23  ;;  %4327 = vmatmul.mubr.msk.bf16.gmra.mrb[16].mxu0 %vm330_vm0, %v3064_v31 }
 0x151   : > { %4162 = vmatprep.mubr.msk.bf16.mxu1 %vm330_vm0, %v1617_v47  ;;  %4330 = vmatprep.mubr.msk.bf16.mxu0 %vm330_vm0, %v3065_v36  ;;  %v5586_v47 = vld [vmem:[%s5772_s2] ss:$0 sm:$0xff] }
 0x158   : > { %4163 = vmatmul.mubr.msk.bf16.vlgmr.msra.gmra.mrb[20].mxu1 %vm330_vm0, %v1618_v3  ;;  %4331 = vmatmul.mubr.msk.bf16.gmra.mrb[20].mxu0 %vm330_vm0, %v3066_v39 }
 0x159   : > { %4166 = vmatprep.mubr.msk.bf16.mxu1 %vm330_vm0, %v1619_v54  ;;  %4334 = vmatprep.mubr.msk.bf16.mxu0 %vm330_vm0, %v3067_v34 }
 0x160   : > { %4167 = vmatmul.mubr.msk.bf16.gmra.mrb[24].mxu1 %vm330_vm0, %v1620_v25  ;;  %4335 = vmatmul.mubr.msk.bf16.gmra.mrb[24].mxu0 %vm330_vm0, %v3068_v28 }
 0x161   : > { %4170 = vmatprep.mubr.msk.bf16.mxu1 %vm330_vm0, %v1621_v38  ;;  %4338 = vmatprep.mubr.msk.bf16.mxu0 %vm330_vm0, %v3069_v2 }
 0x168   : > { %4171 = vmatmul.mubr.msk.bf16.gmra.mrb[28].mxu1 %vm330_vm0, %v1622_v40  ;;  %4339 = vmatmul.mubr.msk.bf16.gmra.mrb[28].mxu0 %vm330_vm0, %v3070_v12 }
 0x169   : > { %4174 = vmatprep.mubr.msk.bf16.mxu1 %vm330_vm0, %v1623_v51  ;;  %4342 = vmatprep.mubr.msk.bf16.mxu0 %vm330_vm0, %v3071_v62 }
 0x170   : > { %4175 = vmatmul.mubr.msk.bf16.gmra.mrb[32].mxu1 %vm330_vm0, %v1624_v52  ;;  %4343 = vmatmul.mubr.msk.bf16.gmra.mrb[32].mxu0 %vm330_vm0, %v3072_v17 }
 0x171   : > { %4178 = vmatprep.mubr.msk.bf16.mxu1 %vm330_vm0, %v1625_v18  ;;  %4346 = vmatprep.mubr.msk.bf16.mxu0 %vm330_vm0, %v3073_v8 }
 0x178   : > { %4179 = vmatmul.mubr.msk.bf16.gmra.mrb[36].mxu1 %vm330_vm0, %v1626_v63  ;;  %4347 = vmatmul.mubr.msk.bf16.gmra.mrb[36].mxu0 %vm330_vm0, %v3074_v5 }
 0x1db   : > { %v4102_v42 = vpop.f32.mrb[0].mxu1 }
 0x1dc   : > { %v1368_v6 = vpop.f32.mrb[1].mxu1 }
 0x1dd   : > { %v4103_v21 = vpop.f32.mrb[2].mxu1 }
 0x1de   : > { %v1371_v13 = vpop.f32.mrb[3].mxu1 }
 0x1e3   : > { %v4106_v20 = vpop.f32.mrb[4].mxu1 }
 0x1e4   : > { %v1384_v32 = vpop.f32.mrb[5].mxu1 }
 0x1e5   : > { %v4107_v19 = vpop.f32.mrb[6].mxu1 }
 0x1e6   : > { %v1387_v53 = vpop.f32.mrb[7].mxu1 }
 0x1eb   : > { %v4110_v10 = vpop.f32.mrb[8].mxu1 }
 0x1ec   : > { %v1400_v14 = vpop.f32.mrb[9].mxu1 }
 0x1ed   : > { %v4111_v35 = vpop.f32.mrb[10].mxu1 }
 0x1ee   : > { %v5564_v4 = vpop.f32.mrb[11].mxu1 }
 0x1f3   : > { %v5566_v57 = vpop.f32.mrb[12].mxu1 }
 0x1f4   : > { %v5568_v22 = vpop.f32.mrb[13].mxu1 }
 0x1f5   : > { %v5570_v15 = vpop.f32.mrb[14].mxu1 }
 0x1f6   : > { %v5572_v27 = vpop.f32.mrb[15].mxu1 }
 0x1fb   : > { %v5574_v60 = vpop.f32.mrb[16].mxu1 }
 0x1fc   : > { %v5576_v29 = vpop.f32.mrb[17].mxu1 }
 0x1fd   : > { %v5578_v26 = vpop.f32.mrb[18].mxu1 }
 0x1fe   : > { %v5580_v23 = vpop.f32.mrb[19].mxu1 }
 0x203   : > { %v4312_v31 = vpop.f32.mrb[0].mxu0 }
 0x204   : > { %v4352_v36 = vadd.f32 %v4312_v31, %v4102_v42  ;;  %v3178_v30 = vpop.f32.mrb[1].mxu0 }
 0x205   : > { %v4353_v61 = vadd.f32 %v3178_v30, %v1368_v6  ;;  %v4313_v56 = vpop.f32.mrb[2].mxu0 }
 0x206   : > { %v3386_v3 = vmul.f32 %v4352_v36, %v5586_v47  ;;  %v4354_v39 = vadd.f32 %v4313_v56, %v4103_v21  ;;  %v3181_v54 = vpop.f32.mrb[3].mxu0 }
 0x207   : > { %v3384_v34 = vmul.f32 %v4353_v61, %v5586_v47  ;;  %v4355_v44 = vadd.f32 %v3181_v54, %v1371_v13 }
 0x208   : > { %v3433_v1 = vadd.f32 %v5591_v33, %v3386_v3  ;;  %v3387_v0 = vmul.f32 %v4354_v39, %v5586_v47 }
 0x209   : > { %v3431_v46 = vadd.f32 %v5591_v33, %v3384_v34  ;;  %v3385_v25 = vmul.f32 %v4355_v44, %v5586_v47 }
 0x20a   : > { %3474 = vst.msk [vmem:[%s5597_s21 + $0x10] sm:$0xff] %vm3471_vm1, %v3433_v1  ;;  %v3434_v28 = vadd.f32 %v5591_v33, %v3387_v0 }
 0x20b   : > { %3472 = vst.msk [vmem:[%s5597_s21] sm:$0xff] %vm3471_vm1, %v3431_v46  ;;  %v3432_v38 = vadd.f32 %v5591_v33, %v3385_v25  ;;  %v4316_v2 = vpop.f32.mrb[4].mxu0 }
 0x20c   : > { %3475 = vst.msk [vmem:[%s5597_s21 + $0x18] sm:$0xff] %vm3471_vm1, %v3434_v28  ;;  %v4356_v45 = vadd.f32 %v4316_v2, %v4106_v20  ;;  %v3194_v50 = vpop.f32.mrb[5].mxu0 }
 0x20d   : > { %3473 = vst.msk [vmem:[%s5597_s21 + $0x8] sm:$0xff] %vm3471_vm1, %v3432_v38  ;;  %v4357_v43 = vadd.f32 %v3194_v50, %v1384_v32  ;;  %v4317_v37 = vpop.f32.mrb[6].mxu0 }
 0x20e   : > { %v3390_v40 = vmul.f32 %v4356_v45, %v5586_v47  ;;  %v4358_v12 = vadd.f32 %v4317_v37, %v4107_v19  ;;  %v3197_v51 = vpop.f32.mrb[7].mxu0 }
 0x20f   : > { %v3388_v62 = vmul.f32 %v4357_v43, %v5586_v47  ;;  %v4359_v58 = vadd.f32 %v3197_v51, %v1387_v53 }
 0x210   : > { %v3437_v55 = vadd.f32 %v5591_v33, %v3390_v40  ;;  %v3391_v9 = vmul.f32 %v4358_v12, %v5586_v47 }
 0x211   : > { %v3435_v59 = vadd.f32 %v5591_v33, %v3388_v62  ;;  %v3389_v49 = vmul.f32 %v4359_v58, %v5586_v47 }
 0x212   : > { %3478 = vst.msk [vmem:[%s5597_s21 + $0x30] sm:$0xff] %vm3471_vm1, %v3437_v55  ;;  %v3438_v41 = vadd.f32 %v5591_v33, %v3391_v9 }
 0x213   : > { %3476 = vst.msk [vmem:[%s5597_s21 + $0x20] sm:$0xff] %vm3471_vm1, %v3435_v59  ;;  %v3436_v48 = vadd.f32 %v5591_v33, %v3389_v49  ;;  %v4320_v52 = vpop.f32.mrb[8].mxu0 }
 0x214   : > { %3479 = vst.msk [vmem:[%s5597_s21 + $0x38] sm:$0xff] %vm3471_vm1, %v3438_v41  ;;  %v4360_v17 = vadd.f32 %v4320_v52, %v4110_v10  ;;  %v3210_v18 = vpop.f32.mrb[9].mxu0 }
 0x215   : > { %3477 = vst.msk [vmem:[%s5597_s21 + $0x28] sm:$0xff] %vm3471_vm1, %v3436_v48  ;;  %v4361_v8 = vadd.f32 %v3210_v18, %v1400_v14  ;;  %v4321_v11 = vpop.f32.mrb[10].mxu0 }
 0x216   : > { %v3394_v16 = vmul.f32 %v4360_v17, %v5586_v47  ;;  %v4362_v7 = vadd.f32 %v4321_v11, %v4111_v35  ;;  %v3213_v24 = vpop.f32.mrb[11].mxu0 }
 0x217   : > { %v3392_v63 = vmul.f32 %v4361_v8, %v5586_v47  ;;  %v4363_v5 = vadd.f32 %v3213_v24, %v5564_v4 }
 0x218   : > { %v3441_v42 = vadd.f32 %v5591_v33, %v3394_v16  ;;  %v3395_v6 = vmul.f32 %v4362_v7, %v5586_v47 }
 0x219   : > { %v3439_v21 = vadd.f32 %v5591_v33, %v3392_v63  ;;  %v3393_v13 = vmul.f32 %v4363_v5, %v5586_v47 }
 0x21a   : > { %3482 = vst.msk [vmem:[%s5597_s21 + $0x50] sm:$0xff] %vm3471_vm1, %v3441_v42  ;;  %v3442_v20 = vadd.f32 %v5591_v33, %v3395_v6 }
 0x21b   : > { %3480 = vst.msk [vmem:[%s5597_s21 + $0x40] sm:$0xff] %vm3471_vm1, %v3439_v21  ;;  %v3440_v32 = vadd.f32 %v5591_v33, %v3393_v13  ;;  %v4324_v19 = vpop.f32.mrb[12].mxu0 }
 0x21c   : > { %3483 = vst.msk [vmem:[%s5597_s21 + $0x58] sm:$0xff] %vm3471_vm1, %v3442_v20  ;;  %v4364_v53 = vadd.f32 %v4324_v19, %v5566_v57  ;;  %v3226_v10 = vpop.f32.mrb[13].mxu0 }
 0x21d   : > { %3481 = vst.msk [vmem:[%s5597_s21 + $0x48] sm:$0xff] %vm3471_vm1, %v3440_v32  ;;  %v4365_v14 = vadd.f32 %v3226_v10, %v5568_v22  ;;  %v4325_v35 = vpop.f32.mrb[14].mxu0 }
 0x21e   : > { %v3398_v4 = vmul.f32 %v4364_v53, %v5586_v47  ;;  %v4366_v31 = vadd.f32 %v4325_v35, %v5570_v15  ;;  %v3229_v36 = vpop.f32.mrb[15].mxu0 }
 0x21f   : > { %v3396_v30 = vmul.f32 %v4365_v14, %v5586_v47  ;;  %v4367_v61 = vadd.f32 %v3229_v36, %v5572_v27 }
 0x220   : > { %v3445_v57 = vadd.f32 %v5591_v33, %v3398_v4  ;;  %v3399_v56 = vmul.f32 %v4366_v31, %v5586_v47 }
 0x221   : > { %v3443_v3 = vadd.f32 %v5591_v33, %v3396_v30  ;;  %v3397_v22 = vmul.f32 %v4367_v61, %v5586_v47 }
 0x222   : > { %3486 = vst.msk [vmem:[%s5597_s21 + $0x70] sm:$0xff] %vm3471_vm1, %v3445_v57  ;;  %v3446_v39 = vadd.f32 %v5591_v33, %v3399_v56 }
 0x223   : > { %3484 = vst.msk [vmem:[%s5597_s21 + $0x60] sm:$0xff] %vm3471_vm1, %v3443_v3  ;;  %v3444_v15 = vadd.f32 %v5591_v33, %v3397_v22  ;;  %v4328_v54 = vpop.f32.mrb[16].mxu0 }
 0x224   : > { %3487 = vst.msk [vmem:[%s5597_s21 + $0x78] sm:$0xff] %vm3471_vm1, %v3446_v39  ;;  %v4368_v27 = vadd.f32 %v4328_v54, %v5574_v60  ;;  %v3242_v34 = vpop.f32.mrb[17].mxu0 }
 0x225   : > { %3485 = vst.msk [vmem:[%s5597_s21 + $0x68] sm:$0xff] %vm3471_vm1, %v3444_v15  ;;  %v4369_v44 = vadd.f32 %v3242_v34, %v5576_v29  ;;  %v4329_v1 = vpop.f32.mrb[18].mxu0 }
 0x226   : > { %v3402_v0 = vmul.f32 %v4368_v27, %v5586_v47  ;;  %v4370_v46 = vadd.f32 %v4329_v1, %v5578_v26  ;;  %v3245_v25 = vpop.f32.mrb[19].mxu0 }
 0x227   : > { %v3400_v28 = vmul.f32 %v4369_v44, %v5586_v47  ;;  %v4371_v38 = vadd.f32 %v3245_v25, %v5580_v23 }
 0x228   : > { %v3449_v60 = vadd.f32 %v5591_v33, %v3402_v0  ;;  %v3403_v2 = vmul.f32 %v4370_v46, %v5586_v47 }
 0x229   : > { %v3447_v45 = vadd.f32 %v5591_v33, %v3400_v28  ;;  %v3401_v29 = vmul.f32 %v4371_v38, %v5586_v47 }
 0x22a   : > { %3490 = vst.msk [vmem:[%s5597_s21 + $0x90] sm:$0xff] %vm3471_vm1, %v3449_v60  ;;  %v3450_v50 = vadd.f32 %v5591_v33, %v3403_v2 }
 0x22b   : > { %v4164_v43 = vpop.f32.mrb[20].mxu1  ;;  %3488 = vst.msk [vmem:[%s5597_s21 + $0x80] sm:$0xff] %vm3471_vm1, %v3447_v45  ;;  %v3448_v26 = vadd.f32 %v5591_v33, %v3401_v29  ;;  %v4332_v37 = vpop.f32.mrb[20].mxu0 }
 0x22c   : > { %v1810_v23 = vpop.f32.mrb[21].mxu1  ;;  %3491 = vst.msk [vmem:[%s5597_s21 + $0x98] sm:$0xff] %vm3471_vm1, %v3450_v50  ;;  %v4372_v40 = vadd.f32 %v4332_v37, %v4164_v43  ;;  %v3258_v12 = vpop.f32.mrb[21].mxu0 }
 0x22d   : > { %v4165_v51 = vpop.f32.mrb[22].mxu1  ;;  %3489 = vst.msk [vmem:[%s5597_s21 + $0x88] sm:$0xff] %vm3471_vm1, %v3448_v26  ;;  %v4373_v62 = vadd.f32 %v3258_v12, %v1810_v23  ;;  %v4333_v58 = vpop.f32.mrb[22].mxu0 }
 0x22e   : > { %v1813_v55 = vpop.f32.mrb[23].mxu1  ;;  %v3406_v9 = vmul.f32 %v4372_v40, %v5586_v47  ;;  %v4374_v59 = vadd.f32 %v4333_v58, %v4165_v51  ;;  %v3261_v49 = vpop.f32.mrb[23].mxu0 }
 0x22f   : > { %v3404_v41 = vmul.f32 %v4373_v62, %v5586_v47  ;;  %v4375_v48 = vadd.f32 %v3261_v49, %v1813_v55 }
 0x230   : > { %v3453_v52 = vadd.f32 %v5591_v33, %v3406_v9  ;;  %v3407_v17 = vmul.f32 %v4374_v59, %v5586_v47 }
 0x231   : > { %v3451_v18 = vadd.f32 %v5591_v33, %v3404_v41  ;;  %v3405_v8 = vmul.f32 %v4375_v48, %v5586_v47 }
 0x232   : > { %3494 = vst.msk [vmem:[%s5597_s21 + $0xb0] sm:$0xff] %vm3471_vm1, %v3453_v52  ;;  %v3454_v11 = vadd.f32 %v5591_v33, %v3407_v17 }
 0x233   : > { %v4168_v16 = vpop.f32.mrb[24].mxu1  ;;  %3492 = vst.msk [vmem:[%s5597_s21 + $0xa0] sm:$0xff] %vm3471_vm1, %v3451_v18  ;;  %v3452_v7 = vadd.f32 %v5591_v33, %v3405_v8  ;;  %v4336_v24 = vpop.f32.mrb[24].mxu0 }
 0x234   : > { %v1826_v63 = vpop.f32.mrb[25].mxu1  ;;  %3495 = vst.msk [vmem:[%s5597_s21 + $0xb8] sm:$0xff] %vm3471_vm1, %v3454_v11  ;;  %v4376_v5 = vadd.f32 %v4336_v24, %v4168_v16  ;;  %v3274_v42 = vpop.f32.mrb[25].mxu0 }
 0x235   : > { %v4169_v6 = vpop.f32.mrb[26].mxu1  ;;  %3493 = vst.msk [vmem:[%s5597_s21 + $0xa8] sm:$0xff] %vm3471_vm1, %v3452_v7  ;;  %v4377_v21 = vadd.f32 %v3274_v42, %v1826_v63  ;;  %v4337_v13 = vpop.f32.mrb[26].mxu0 }
 0x236   : > { %v1829_v20 = vpop.f32.mrb[27].mxu1  ;;  %v3410_v32 = vmul.f32 %v4376_v5, %v5586_v47  ;;  %v4378_v19 = vadd.f32 %v4337_v13, %v4169_v6  ;;  %v3277_v53 = vpop.f32.mrb[27].mxu0 }
 0x237   : > { %v3408_v10 = vmul.f32 %v4377_v21, %v5586_v47  ;;  %v4379_v14 = vadd.f32 %v3277_v53, %v1829_v20 }
 0x238   : > { %v3457_v35 = vadd.f32 %v5591_v33, %v3410_v32  ;;  %v3411_v4 = vmul.f32 %v4378_v19, %v5586_v47 }
 0x239   : > { %v3455_v31 = vadd.f32 %v5591_v33, %v3408_v10  ;;  %v3409_v36 = vmul.f32 %v4379_v14, %v5586_v47 }
 0x23a   : > { %3498 = vst.msk [vmem:[%s5597_s21 + $0xd0] sm:$0xff] %vm3471_vm1, %v3457_v35  ;;  %v3458_v30 = vadd.f32 %v5591_v33, %v3411_v4 }
 0x23b   : > { %v4172_v61 = vpop.f32.mrb[28].mxu1  ;;  %3496 = vst.msk [vmem:[%s5597_s21 + $0xc0] sm:$0xff] %vm3471_vm1, %v3455_v31  ;;  %v3456_v57 = vadd.f32 %v5591_v33, %v3409_v36  ;;  %v4340_v56 = vpop.f32.mrb[28].mxu0 }
 0x23c   : > { %v1842_v3 = vpop.f32.mrb[29].mxu1  ;;  %3499 = vst.msk [vmem:[%s5597_s21 + $0xd8] sm:$0xff] %vm3471_vm1, %v3458_v30  ;;  %v4380_v22 = vadd.f32 %v4340_v56, %v4172_v61  ;;  %v3290_v39 = vpop.f32.mrb[29].mxu0 }
 0x23d   : > { %v4173_v15 = vpop.f32.mrb[30].mxu1  ;;  %3497 = vst.msk [vmem:[%s5597_s21 + $0xc8] sm:$0xff] %vm3471_vm1, %v3456_v57  ;;  %v4381_v54 = vadd.f32 %v3290_v39, %v1842_v3  ;;  %v4341_v27 = vpop.f32.mrb[30].mxu0 }
 0x23e   : > { %v1845_v34 = vpop.f32.mrb[31].mxu1  ;;  %v3414_v44 = vmul.f32 %v4380_v22, %v5586_v47  ;;  %v4382_v1 = vadd.f32 %v4341_v27, %v4173_v15  ;;  %v3293_v0 = vpop.f32.mrb[31].mxu0 }
 0x23f   : > { %v3412_v46 = vmul.f32 %v4381_v54, %v5586_v47  ;;  %v4383_v25 = vadd.f32 %v3293_v0, %v1845_v34 }
 0x240   : > { %v3461_v28 = vadd.f32 %v5591_v33, %v3414_v44  ;;  %v3415_v38 = vmul.f32 %v4382_v1, %v5586_v47 }
 0x241   : > { %v3459_v60 = vadd.f32 %v5591_v33, %v3412_v46  ;;  %v3413_v2 = vmul.f32 %v4383_v25, %v5586_v47 }
 0x242   : > { %3502 = vst.msk [vmem:[%s5597_s21 + $0xf0] sm:$0xff] %vm3471_vm1, %v3461_v28  ;;  %v3462_v45 = vadd.f32 %v5591_v33, %v3415_v38 }
 0x243   : > { %v4176_v29 = vpop.f32.mrb[32].mxu1  ;;  %3500 = vst.msk [vmem:[%s5597_s21 + $0xe0] sm:$0xff] %vm3471_vm1, %v3459_v60  ;;  %v3460_v50 = vadd.f32 %v5591_v33, %v3413_v2  ;;  %v4344_v43 = vpop.f32.mrb[32].mxu0 }
 0x244   : > { %v1858_v26 = vpop.f32.mrb[33].mxu1  ;;  %3503 = vst.msk [vmem:[%s5597_s21 + $0xf8] sm:$0xff] %vm3471_vm1, %v3462_v45  ;;  %v4384_v37 = vadd.f32 %v4344_v43, %v4176_v29  ;;  %v3306_v23 = vpop.f32.mrb[33].mxu0 }
 0x245   : > { %v4177_v40 = vpop.f32.mrb[34].mxu1  ;;  %3501 = vst.msk [vmem:[%s5597_s21 + $0xe8] sm:$0xff] %vm3471_vm1, %v3460_v50  ;;  %v4385_v12 = vadd.f32 %v3306_v23, %v1858_v26  ;;  %v4345_v51 = vpop.f32.mrb[34].mxu0 }
 0x246   : > { %v1861_v62 = vpop.f32.mrb[35].mxu1  ;;  %v3418_v58 = vmul.f32 %v4384_v37, %v5586_v47  ;;  %v4386_v55 = vadd.f32 %v4345_v51, %v4177_v40  ;;  %v3309_v9 = vpop.f32.mrb[35].mxu0 }
 0x247   : > { %v3416_v59 = vmul.f32 %v4385_v12, %v5586_v47  ;;  %v4387_v49 = vadd.f32 %v3309_v9, %v1861_v62 }
 0x248   : > { %v3465_v41 = vadd.f32 %v5591_v33, %v3418_v58  ;;  %v3419_v48 = vmul.f32 %v4386_v55, %v5586_v47 }
 0x249   : > { %v3463_v52 = vadd.f32 %v5591_v33, %v3416_v59  ;;  %v3417_v17 = vmul.f32 %v4387_v49, %v5586_v47 }
 0x24a   : > { %3506 = vst.msk [vmem:[%s5597_s21 + $0x110] sm:$0xff] %vm3471_vm1, %v3465_v41  ;;  %v3466_v18 = vadd.f32 %v5591_v33, %v3419_v48 }
 0x24b   : > { %v4180_v8 = vpop.f32.mrb[36].mxu1  ;;  %3504 = vst.msk [vmem:[%s5597_s21 + $0x100] sm:$0xff] %vm3471_vm1, %v3463_v52  ;;  %v3464_v11 = vadd.f32 %v5591_v33, %v3417_v17  ;;  %v4348_v16 = vpop.f32.mrb[36].mxu0 }
 0x24c   : > { %v1874_v7 = vpop.f32.mrb[37].mxu1  ;;  %3507 = vst.msk [vmem:[%s5597_s21 + $0x118] sm:$0xff] %vm3471_vm1, %v3466_v18  ;;  %v4388_v24 = vadd.f32 %v4348_v16, %v4180_v8  ;;  %v3322_v63 = vpop.f32.mrb[37].mxu0 }
 0x24d   : > { %v4181_v5 = vpop.f32.mrb[38].mxu1  ;;  %3505 = vst.msk [vmem:[%s5597_s21 + $0x108] sm:$0xff] %vm3471_vm1, %v3464_v11  ;;  %v4389_v42 = vadd.f32 %v3322_v63, %v1874_v7  ;;  %v4349_v6 = vpop.f32.mrb[38].mxu0 }
 0x24e   : > { %v1877_v21 = vpop.f32.mrb[39].mxu1  ;;  %v3422_v13 = vmul.f32 %v4388_v24, %v5586_v47  ;;  %v4390_v20 = vadd.f32 %v4349_v6, %v4181_v5  ;;  %v3325_v32 = vpop.f32.mrb[39].mxu0 }
 0x24f   : > { %v3420_v19 = vmul.f32 %v4389_v42, %v5586_v47  ;;  %v4391_v53 = vadd.f32 %v3325_v32, %v1877_v21 }
 0x250   : > { %v3469_v10 = vadd.f32 %v5591_v33, %v3422_v13  ;;  %v3423_v14 = vmul.f32 %v4390_v20, %v5586_v47 }
 0x251   : > { %v3467_v35 = vadd.f32 %v5591_v33, %v3420_v19  ;;  %v3421_v4 = vmul.f32 %v4391_v53, %v5586_v47 }
 0x252   : > { %3510 = vst.msk [vmem:[%s5597_s21 + $0x130] sm:$0xff] %vm3471_vm1, %v3469_v10  ;;  %v3470_v31 = vadd.f32 %v5591_v33, %v3423_v14 }
 0x253   : > { %3508 = vst.msk [vmem:[%s5597_s21 + $0x120] sm:$0xff] %vm3471_vm1, %v3467_v35  ;;  %v3468_v36 = vadd.f32 %v5591_v33, %v3421_v4 }
 0x254   : > { %3511 = vst.msk [vmem:[%s5597_s21 + $0x138] sm:$0xff] %vm3471_vm1, %v3470_v31 }
 0x255   : > { %3509 = vst.msk [vmem:[%s5597_s21 + $0x128] sm:$0xff] %vm3471_vm1, %v3468_v36 }
 0x256 PF: > { %s14_s15 = sadd.s32 1, %s4697_s15  }
 0x257   : > { %p11_p4 = scmp.ge.s32.totalorder %s14_s15, 4  }
 0x259   :  { %13 = sbr.rel (!%p11_p4) target bundleno = 1 (0x1), region = 74 }

</bundles_post_ra>
